<compile_context>
chip_gen: v6e
topology: v6e:2x2x1
jax: 0.10.0
libtpu: 0.0.40
codegen_flags: <defaults>
</compile_context>

<pallas_src>
import functools

import jax
import jax.numpy as jnp
from jax import lax
from jax.experimental import pallas as pl
from jax.experimental.pallas import tpu as pltpu


def _bottleneck_kernel(x_ref, w1_ref, s1_ref, b1_ref,
                       w2_ref, s2_ref, b2_ref,
                       w3_ref, s3_ref, b3_ref,
                       o_ref, *, H, W):
    HW = H * W
    P = w1_ref.shape[1]

    x = x_ref[0].astype(jnp.float32)          # (HW, Cin), residual kept in f32
    x_lo = x.astype(jnp.bfloat16)             # MXU input

    # conv1 (1x1, no bias) + bn1 + relu -- bf16 MXU, f32 accumulate, f32 epilogue
    h1 = jnp.dot(x_lo, w1_ref[...], preferred_element_type=jnp.float32)
    h1 = jnp.maximum(h1 * s1_ref[...] + b1_ref[...], 0.0)

    # conv2 (3x3, stride=1, pad=1, no bias):
    #   one fused MXU call (HW, P) @ (P, 9P) gives t_k = h1 @ w2[k] for all 9
    #   taps; each tap is then shifted by (dy*W + dx) along the flattened row
    #   axis with zero fill, boundary columns masked, and accumulated in f32.
    t = jnp.dot(h1.astype(jnp.bfloat16), w2_ref[...],
                preferred_element_type=jnp.float32)          # (HW, 9P)

    col = jax.lax.broadcasted_iota(jnp.int32, (HW, P), 0) % W
    at_left = col == 0
    at_right = col == (W - 1)

    def shift_rows(v, s):
        # r[i] = v[i + s] along axis 0, zero-filled at the edges (exact zero
        # padding for the dy = +/-1 image rows comes for free from the fill).
        if s == 0:
            return v
        z = jnp.zeros((abs(s), P), v.dtype)
        if s > 0:
            return jnp.concatenate([v[s:], z], axis=0)
        return jnp.concatenate([z, v[:s]], axis=0)

    acc = jnp.zeros((HW, P), jnp.float32)
    for k in range(9):                         # static unroll: 9 taps
        dy, dx = k // 3 - 1, k % 3 - 1
        tk = t[:, k * P:(k + 1) * P]
        tk = shift_rows(tk, dy * W + dx)
        if dx == 1:                            # x+1 out of image at x == W-1
            tk = jnp.where(at_right, 0.0, tk)
        elif dx == -1:                         # x-1 out of image at x == 0
            tk = jnp.where(at_left, 0.0, tk)
        acc = acc + tk
    h2 = jnp.maximum(acc * s2_ref[...] + b2_ref[...], 0.0)

    # conv3 (1x1, no bias) + bn3, then residual add + relu
    h3 = jnp.dot(h2.astype(jnp.bfloat16), w3_ref[...],
                 preferred_element_type=jnp.float32)
    h3 = h3 * s3_ref[...] + b3_ref[...]
    o_ref[0] = jnp.maximum(h3 + x, 0.0).astype(o_ref.dtype)


def bottleneck_forward_nhwc(x_nhwc, params):
    """Core entry point, NHWC in / NHWC out (no layout transposes)."""
    w1, s1, b1, w2, s2, b2, w3, s3, b3 = params
    N, H, W, Cin = x_nhwc.shape
    P = w1.shape[1]
    Cout = w3.shape[1]
    if Cin != Cout:
        raise ValueError(
            f"stride=1 / downsample=None requires Cin == Cout ({Cin} vs {Cout})")

    # MXU inputs in bf16 (accumulation stays f32 inside the kernel).
    w1b = w1.astype(jnp.bfloat16)
    # (9, P, P) tap-major -> (P, 9P): all 9 taps in one MXU call.
    w2b = jnp.transpose(w2, (1, 0, 2)).reshape(P, 9 * P).astype(jnp.bfloat16)
    w3b = w3.astype(jnp.bfloat16)

    x2 = x_nhwc.reshape(N, H * W, Cin)
    kernel = functools.partial(_bottleneck_kernel, H=H, W=W)

    # Per-grid-step VMEM estimate: double-buffered x/out tiles + (2x) weights +
    # in-kernel f32 temporaries (h1, t, acc, h2, ...). Clamped so it stays well
    # under v7x's 64 MiB while lifting v5e's 16 MiB default.
    est = 2 * 4 * H * W * (Cin + Cout)                       # x / out tiles
    est += 2 * 2 * (w1b.size + w2b.size + w3b.size)          # bf16 weights
    est += 4 * H * W * (12 * P)                              # temporaries
    vmem_limit = int(min(max(2 * est, 32 * 1024 * 1024), 48 * 1024 * 1024))

    out = pl.pallas_call(
        kernel,
        out_shape=jax.ShapeDtypeStruct((N, H * W, Cout), x_nhwc.dtype),
        grid_spec=pltpu.PrefetchScalarGridSpec(
            num_scalar_prefetch=0,
            grid=(N,),
            in_specs=[
                pl.BlockSpec((1, H * W, Cin), lambda n: (n, 0, 0)),
                pl.BlockSpec(w1b.shape, lambda n: (0, 0)),
                pl.BlockSpec(s1.shape, lambda n: (0, 0)),
                pl.BlockSpec(b1.shape, lambda n: (0, 0)),
                pl.BlockSpec(w2b.shape, lambda n: (0, 0)),
                pl.BlockSpec(s2.shape, lambda n: (0, 0)),
                pl.BlockSpec(b2.shape, lambda n: (0, 0)),
                pl.BlockSpec(w3b.shape, lambda n: (0, 0)),
                pl.BlockSpec(s3.shape, lambda n: (0, 0)),
                pl.BlockSpec(b3.shape, lambda n: (0, 0)),
            ],
            out_specs=pl.BlockSpec((1, H * W, Cout), lambda n: (n, 0, 0)),
        ),
        compiler_params=pltpu.CompilerParams(
            dimension_semantics=("parallel",),   # batch images are independent
            vmem_limit_bytes=vmem_limit),
    )(x2, w1b, s1, b1, w2b, s2, b2, w3b, s3, b3)

    return out.reshape(N, H, W, Cout)


def bottleneck_forward(x_nchw, params):
    """PyTorch-convention wrapper: (N, C, H, W) in / out.

    NOTE: prefer bottleneck_forward_nhwc at a real module boundary -- the two
    transposes here are extra full HBM passes over the activations.
    """
    x = jnp.transpose(x_nchw, (0, 2, 3, 1))
    out = bottleneck_forward_nhwc(x, params)
    return jnp.transpose(out, (0, 3, 1, 2))


def init_params(key, inplanes, planes, dtype=jnp.float32):
    """Deterministic synthetic weights; BN folded into (scale, bias)."""
    expansion = 4
    ks = jax.random.split(key, 15)

    def conv_w(k, fan_in, shape):
        return jax.random.normal(k, shape, dtype) / jnp.sqrt(float(fan_in))

    # conv weights stored pre-transposed for NHWC matmuls:
    w1 = conv_w(ks[0], inplanes, (inplanes, planes))           # 1x1: Cin -> P
    w2 = conv_w(ks[1], 9 * planes, (9, planes, planes))        # 3x3: P -> P (tap-major)
    w3 = conv_w(ks[2], planes, (planes, planes * expansion))   # 1x1: P -> 4P

    def bn_fold(k4, c):
        kg, kb, km, kv = jax.random.split(k4, 4)
        gamma = 1.0 + 0.1 * jax.random.normal(kg, (1, c), dtype)
        beta = 0.1 * jax.random.normal(kb, (1, c), dtype)
        mean = 0.1 * jax.random.normal(km, (1, c), dtype)
        var = jnp.abs(jax.random.normal(kv, (1, c), dtype)) + 0.5
        scale = gamma / jnp.sqrt(var + 1e-5)
        bias = beta - mean * scale
        return scale, bias

    s1, b1 = bn_fold(ks[3], planes)
    s2, b2 = bn_fold(ks[4], planes)
    s3, b3 = bn_fold(ks[5], planes * expansion)
    return (w1, s1, b1, w2, s2, b2, w3, s3, b3)


def bottleneck_ref(x_nchw, params, matmul_dtype=jnp.float32):
    """Pure-JAX reference (XLA convs). matmul_dtype=jnp.bfloat16 emulates the
    kernel's bf16 MXU inputs with f32 accumulation."""
    w1, s1, b1, w2, s2, b2, w3, s3, b3 = params
    P = w1.shape[1]
    x = jnp.transpose(x_nchw, (0, 2, 3, 1)).astype(jnp.float32)

    def q(a):  # round to matmul input dtype, compute in f32 (exact products)
        return a.astype(matmul_dtype).astype(jnp.float32)

    def conv1x1(h, w):
        return jnp.einsum('nhwc,cd->nhwd', q(h), q(w),
                          precision=lax.Precision.HIGHEST)

    h = jnp.maximum(conv1x1(x, w1) * s1 + b1, 0.0)
    h = lax.conv_general_dilated(
        q(h), q(w2.reshape(3, 3, P, P)), window_strides=(1, 1), padding='SAME',
        dimension_numbers=('NHWC', 'HWIO', 'NHWC'),
        precision=lax.Precision.HIGHEST)
    h = jnp.maximum(h * s2 + b2, 0.0)
    h = conv1x1(h, w3) * s3 + b3
    out = jnp.maximum(h + x, 0.0)
    return jnp.transpose(out, (0, 3, 1, 2))


if __name__ == "__main__":
    key = jax.random.PRNGKey(0)
    kx, kp = jax.random.split(key)

    # downsample=None & stride=1 => inplanes must equal planes * expansion
    N, planes, H, W = 2, 8, 16, 16
    inplanes = planes * 4  # 32
    x = jax.random.normal(kx, (N, inplanes, H, W), jnp.float32)
    params = init_params(kp, inplanes, planes)

    out = jax.block_until_ready(bottleneck_forward(x, params))
    assert out.shape == (N, planes * 4, H, W), out.shape

    # Tight check vs a reference that matches the kernel's bf16 MXU inputs,
    # plus a loose sanity check vs the full-f32 reference.
    ref_bf = bottleneck_ref(x, params, matmul_dtype=jnp.bfloat16)
    ref_f32 = bottleneck_ref(x, params)
    err_bf = float(jnp.max(jnp.abs(out - ref_bf)))
    err_f32 = float(jnp.max(jnp.abs(out - ref_f32)))
    if err_bf > 5e-3:
        raise AssertionError(f"Pallas vs bf16-matched reference: max abs err {err_bf}")
    if err_f32 > 1e-1:
        raise AssertionError(f"Pallas vs f32 reference: max abs err {err_f32}")

    print("KERNEL_OK")
</pallas_src>

<mosaic_0001>
module attributes {stable_mosaic.version = 11 : i64} {
  func.func @_bottleneck_kernel(%arg0: i32, %arg1: memref<1x256x32xf32, #tpu.memory_space<vmem>>, %arg2: memref<32x8xbf16, #tpu.memory_space<vmem>>, %arg3: memref<1x8xf32, #tpu.memory_space<vmem>>, %arg4: memref<1x8xf32, #tpu.memory_space<vmem>>, %arg5: memref<8x72xbf16, #tpu.memory_space<vmem>>, %arg6: memref<1x8xf32, #tpu.memory_space<vmem>>, %arg7: memref<1x8xf32, #tpu.memory_space<vmem>>, %arg8: memref<8x32xbf16, #tpu.memory_space<vmem>>, %arg9: memref<1x32xf32, #tpu.memory_space<vmem>>, %arg10: memref<1x32xf32, #tpu.memory_space<vmem>>, %arg11: memref<1x256x32xf32, #tpu.memory_space<vmem>>) attributes {dimension_semantics = [#tpu.dimension_semantics<parallel>], iteration_bounds = array<i64: 2>, scalar_prefetch = 0 : i64, scratch_operands = 0 : i64, tpu.core_type = #tpu.core_type<tc>, window_params = [{transform_indices = @transform_0, window_bounds = array<i64: 1, 256, 32>}, {pipeline_mode = #tpu.pipeline_mode<synchronous>, transform_indices = @transform_1, window_bounds = array<i64: 32, 8>}, {pipeline_mode = #tpu.pipeline_mode<synchronous>, transform_indices = @transform_2, window_bounds = array<i64: 1, 8>}, {pipeline_mode = #tpu.pipeline_mode<synchronous>, transform_indices = @transform_3, window_bounds = array<i64: 1, 8>}, {pipeline_mode = #tpu.pipeline_mode<synchronous>, transform_indices = @transform_4, window_bounds = array<i64: 8, 72>}, {pipeline_mode = #tpu.pipeline_mode<synchronous>, transform_indices = @transform_5, window_bounds = array<i64: 1, 8>}, {pipeline_mode = #tpu.pipeline_mode<synchronous>, transform_indices = @transform_6, window_bounds = array<i64: 1, 8>}, {pipeline_mode = #tpu.pipeline_mode<synchronous>, transform_indices = @transform_7, window_bounds = array<i64: 8, 32>}, {pipeline_mode = #tpu.pipeline_mode<synchronous>, transform_indices = @transform_8, window_bounds = array<i64: 1, 32>}, {pipeline_mode = #tpu.pipeline_mode<synchronous>, transform_indices = @transform_9, window_bounds = array<i64: 1, 32>}, {transform_indices = @transform_10, window_bounds = array<i64: 1, 256, 32>}]} {
    %c0 = arith.constant 0 : index
    %c0_0 = arith.constant 0 : index
    %c0_1 = arith.constant 0 : index
    %0 = vector.load %arg1[%c0, %c0_0, %c0_1] : memref<1x256x32xf32, #tpu.memory_space<vmem>>, vector<1x256x32xf32>
    %1 = vector.shape_cast %0 : vector<1x256x32xf32> to vector<256x32xf32>
    %2 = arith.truncf %1 : vector<256x32xf32> to vector<256x32xbf16>
    %c0_2 = arith.constant 0 : index
    %c0_3 = arith.constant 0 : index
    %3 = vector.load %arg2[%c0_2, %c0_3] : memref<32x8xbf16, #tpu.memory_space<vmem>>, vector<32x8xbf16>
    %cst = arith.constant dense<0.000000e+00> : vector<256x8xf32>
    %4 = tpu.matmul %2, %3, %cst {dimension_numbers = #tpu.dot_dimension_numbers<[1], [0], [0], [1], [0, 0, 1, 1], [], []>} : vector<256x32xbf16>, vector<32x8xbf16>, vector<256x8xf32> -> vector<256x8xf32>
    %c0_4 = arith.constant 0 : index
    %c0_5 = arith.constant 0 : index
    %5 = vector.load %arg3[%c0_4, %c0_5] : memref<1x8xf32, #tpu.memory_space<vmem>>, vector<1x8xf32>
    %6 = vector.broadcast %5 : vector<1x8xf32> to vector<256x8xf32>
    %7 = arith.mulf %4, %6 : vector<256x8xf32>
    %c0_6 = arith.constant 0 : index
    %c0_7 = arith.constant 0 : index
    %8 = vector.load %arg4[%c0_6, %c0_7] : memref<1x8xf32, #tpu.memory_space<vmem>>, vector<1x8xf32>
    %9 = vector.broadcast %8 : vector<1x8xf32> to vector<256x8xf32>
    %10 = arith.addf %7, %9 : vector<256x8xf32>
    %cst_8 = arith.constant 0.000000e+00 : f32
    %11 = vector.broadcast %cst_8 : f32 to vector<256x8xf32>
    %12 = arith.maximumf %10, %11 : vector<256x8xf32>
    %13 = arith.truncf %12 : vector<256x8xf32> to vector<256x8xbf16>
    %c0_9 = arith.constant 0 : index
    %c0_10 = arith.constant 0 : index
    %14 = vector.load %arg5[%c0_9, %c0_10] : memref<8x72xbf16, #tpu.memory_space<vmem>>, vector<8x72xbf16>
    %cst_11 = arith.constant dense<0.000000e+00> : vector<256x72xf32>
    %15 = tpu.matmul %13, %14, %cst_11 {dimension_numbers = #tpu.dot_dimension_numbers<[1], [0], [0], [1], [0, 0, 1, 1], [], []>} : vector<256x8xbf16>, vector<8x72xbf16>, vector<256x72xf32> -> vector<256x72xf32>
    %16 = tpu.iota {dimensions = array<i32: 0>} : vector<256x8xi32>
    %c16_i32 = arith.constant 16 : i32
    %c0_i32 = arith.constant 0 : i32
    %17 = arith.cmpi eq, %c16_i32, %c0_i32 : i32
    %c1_i32 = arith.constant 1 : i32
    %18 = arith.select %17, %c1_i32, %c16_i32 : i32
    %19 = vector.broadcast %18 : i32 to vector<256x8xi32>
    %20 = arith.remsi %16, %19 : vector<256x8xi32>
    %c0_i32_12 = arith.constant 0 : i32
    %21 = vector.broadcast %c0_i32_12 : i32 to vector<256x8xi32>
    %22 = arith.cmpi ne, %20, %21 : vector<256x8xi32>
    %c0_i32_13 = arith.constant 0 : i32
    %23 = vector.broadcast %c0_i32_13 : i32 to vector<256x8xi32>
    %24 = arith.cmpi slt, %20, %23 : vector<256x8xi32>
    %c0_i32_14 = arith.constant 0 : i32
    %25 = arith.cmpi slt, %18, %c0_i32_14 : i32
    %26 = vector.broadcast %25 : i1 to vector<256x8xi1>
    %27 = vector.broadcast %26 : vector<256x8xi1> to vector<256x8xi1>
    %28 = arith.xori %24, %27 : vector<256x8xi1>
    %29 = arith.andi %28, %22 : vector<256x8xi1>
    %30 = vector.broadcast %18 : i32 to vector<256x8xi32>
    %31 = arith.addi %20, %30 : vector<256x8xi32>
    %32 = arith.select %29, %31, %20 : vector<256x8xi1>, vector<256x8xi32>
    %c0_i32_15 = arith.constant 0 : i32
    %33 = vector.broadcast %c0_i32_15 : i32 to vector<256x8xi32>
    %34 = arith.cmpi eq, %32, %33 : vector<256x8xi32>
    %c15_i32 = arith.constant 15 : i32
    %35 = vector.broadcast %c15_i32 : i32 to vector<256x8xi32>
    %36 = arith.cmpi eq, %32, %35 : vector<256x8xi32>
    %cst_16 = arith.constant 0.000000e+00 : f32
    %37 = vector.broadcast %cst_16 : f32 to vector<256x8xf32>
    %38 = vector.extract_strided_slice %15 {offsets = [0, 0], sizes = [256, 8], strides = [1, 1]} : vector<256x72xf32> to vector<256x8xf32>
    %cst_17 = arith.constant 0.000000e+00 : f32
    %39 = vector.broadcast %cst_17 : f32 to vector<17x8xf32>
    %40 = vector.extract_strided_slice %38 {offsets = [0, 0], sizes = [239, 8], strides = [1, 1]} : vector<256x8xf32> to vector<239x8xf32>
    %41 = tpu.concatenate %39, %40 in 0 : vector<17x8xf32>, vector<239x8xf32> -> vector<256x8xf32>
    %cst_18 = arith.constant 0.000000e+00 : f32
    %42 = vector.broadcast %cst_18 : f32 to vector<256x8xf32>
    %43 = arith.select %34, %42, %41 : vector<256x8xi1>, vector<256x8xf32>
    %44 = arith.addf %37, %43 : vector<256x8xf32>
    %45 = vector.extract_strided_slice %15 {offsets = [0, 8], sizes = [256, 8], strides = [1, 1]} : vector<256x72xf32> to vector<256x8xf32>
    %cst_19 = arith.constant 0.000000e+00 : f32
    %46 = vector.broadcast %cst_19 : f32 to vector<16x8xf32>
    %47 = vector.extract_strided_slice %45 {offsets = [0, 0], sizes = [240, 8], strides = [1, 1]} : vector<256x8xf32> to vector<240x8xf32>
    %48 = tpu.concatenate %46, %47 in 0 : vector<16x8xf32>, vector<240x8xf32> -> vector<256x8xf32>
    %49 = arith.addf %44, %48 : vector<256x8xf32>
    %50 = vector.extract_strided_slice %15 {offsets = [0, 16], sizes = [256, 8], strides = [1, 1]} : vector<256x72xf32> to vector<256x8xf32>
    %cst_20 = arith.constant 0.000000e+00 : f32
    %51 = vector.broadcast %cst_20 : f32 to vector<15x8xf32>
    %52 = vector.extract_strided_slice %50 {offsets = [0, 0], sizes = [241, 8], strides = [1, 1]} : vector<256x8xf32> to vector<241x8xf32>
    %53 = tpu.concatenate %51, %52 in 0 : vector<15x8xf32>, vector<241x8xf32> -> vector<256x8xf32>
    %cst_21 = arith.constant 0.000000e+00 : f32
    %54 = vector.broadcast %cst_21 : f32 to vector<256x8xf32>
    %55 = arith.select %36, %54, %53 : vector<256x8xi1>, vector<256x8xf32>
    %56 = arith.addf %49, %55 : vector<256x8xf32>
    %57 = vector.extract_strided_slice %15 {offsets = [0, 24], sizes = [256, 8], strides = [1, 1]} : vector<256x72xf32> to vector<256x8xf32>
    %cst_22 = arith.constant 0.000000e+00 : f32
    %58 = vector.broadcast %cst_22 : f32 to vector<1x8xf32>
    %59 = vector.extract_strided_slice %57 {offsets = [0, 0], sizes = [255, 8], strides = [1, 1]} : vector<256x8xf32> to vector<255x8xf32>
    %60 = tpu.concatenate %58, %59 in 0 : vector<1x8xf32>, vector<255x8xf32> -> vector<256x8xf32>
    %cst_23 = arith.constant 0.000000e+00 : f32
    %61 = vector.broadcast %cst_23 : f32 to vector<256x8xf32>
    %62 = arith.select %34, %61, %60 : vector<256x8xi1>, vector<256x8xf32>
    %63 = arith.addf %56, %62 : vector<256x8xf32>
    %64 = vector.extract_strided_slice %15 {offsets = [0, 32], sizes = [256, 8], strides = [1, 1]} : vector<256x72xf32> to vector<256x8xf32>
    %65 = arith.addf %63, %64 : vector<256x8xf32>
    %66 = vector.extract_strided_slice %15 {offsets = [0, 40], sizes = [256, 8], strides = [1, 1]} : vector<256x72xf32> to vector<256x8xf32>
    %cst_24 = arith.constant 0.000000e+00 : f32
    %67 = vector.broadcast %cst_24 : f32 to vector<1x8xf32>
    %68 = vector.extract_strided_slice %66 {offsets = [1, 0], sizes = [255, 8], strides = [1, 1]} : vector<256x8xf32> to vector<255x8xf32>
    %69 = tpu.concatenate %68, %67 in 0 : vector<255x8xf32>, vector<1x8xf32> -> vector<256x8xf32>
    %cst_25 = arith.constant 0.000000e+00 : f32
    %70 = vector.broadcast %cst_25 : f32 to vector<256x8xf32>
    %71 = arith.select %36, %70, %69 : vector<256x8xi1>, vector<256x8xf32>
    %72 = arith.addf %65, %71 : vector<256x8xf32>
    %73 = vector.extract_strided_slice %15 {offsets = [0, 48], sizes = [256, 8], strides = [1, 1]} : vector<256x72xf32> to vector<256x8xf32>
    %cst_26 = arith.constant 0.000000e+00 : f32
    %74 = vector.broadcast %cst_26 : f32 to vector<15x8xf32>
    %75 = vector.extract_strided_slice %73 {offsets = [15, 0], sizes = [241, 8], strides = [1, 1]} : vector<256x8xf32> to vector<241x8xf32>
    %76 = tpu.concatenate %75, %74 in 0 : vector<241x8xf32>, vector<15x8xf32> -> vector<256x8xf32>
    %cst_27 = arith.constant 0.000000e+00 : f32
    %77 = vector.broadcast %cst_27 : f32 to vector<256x8xf32>
    %78 = arith.select %34, %77, %76 : vector<256x8xi1>, vector<256x8xf32>
    %79 = arith.addf %72, %78 : vector<256x8xf32>
    %80 = vector.extract_strided_slice %15 {offsets = [0, 56], sizes = [256, 8], strides = [1, 1]} : vector<256x72xf32> to vector<256x8xf32>
    %cst_28 = arith.constant 0.000000e+00 : f32
    %81 = vector.broadcast %cst_28 : f32 to vector<16x8xf32>
    %82 = vector.extract_strided_slice %80 {offsets = [16, 0], sizes = [240, 8], strides = [1, 1]} : vector<256x8xf32> to vector<240x8xf32>
    %83 = tpu.concatenate %82, %81 in 0 : vector<240x8xf32>, vector<16x8xf32> -> vector<256x8xf32>
    %84 = arith.addf %79, %83 : vector<256x8xf32>
    %85 = vector.extract_strided_slice %15 {offsets = [0, 64], sizes = [256, 8], strides = [1, 1]} : vector<256x72xf32> to vector<256x8xf32>
    %cst_29 = arith.constant 0.000000e+00 : f32
    %86 = vector.broadcast %cst_29 : f32 to vector<17x8xf32>
    %87 = vector.extract_strided_slice %85 {offsets = [17, 0], sizes = [239, 8], strides = [1, 1]} : vector<256x8xf32> to vector<239x8xf32>
    %88 = tpu.concatenate %87, %86 in 0 : vector<239x8xf32>, vector<17x8xf32> -> vector<256x8xf32>
    %cst_30 = arith.constant 0.000000e+00 : f32
    %89 = vector.broadcast %cst_30 : f32 to vector<256x8xf32>
    %90 = arith.select %36, %89, %88 : vector<256x8xi1>, vector<256x8xf32>
    %91 = arith.addf %84, %90 : vector<256x8xf32>
    %c0_31 = arith.constant 0 : index
    %c0_32 = arith.constant 0 : index
    %92 = vector.load %arg6[%c0_31, %c0_32] : memref<1x8xf32, #tpu.memory_space<vmem>>, vector<1x8xf32>
    %93 = vector.broadcast %92 : vector<1x8xf32> to vector<256x8xf32>
    %94 = arith.mulf %91, %93 : vector<256x8xf32>
    %c0_33 = arith.constant 0 : index
    %c0_34 = arith.constant 0 : index
    %95 = vector.load %arg7[%c0_33, %c0_34] : memref<1x8xf32, #tpu.memory_space<vmem>>, vector<1x8xf32>
    %96 = vector.broadcast %95 : vector<1x8xf32> to vector<256x8xf32>
    %97 = arith.addf %94, %96 : vector<256x8xf32>
    %cst_35 = arith.constant 0.000000e+00 : f32
    %98 = vector.broadcast %cst_35 : f32 to vector<256x8xf32>
    %99 = arith.maximumf %97, %98 : vector<256x8xf32>
    %100 = arith.truncf %99 : vector<256x8xf32> to vector<256x8xbf16>
    %c0_36 = arith.constant 0 : index
    %c0_37 = arith.constant 0 : index
    %101 = vector.load %arg8[%c0_36, %c0_37] : memref<8x32xbf16, #tpu.memory_space<vmem>>, vector<8x32xbf16>
    %cst_38 = arith.constant dense<0.000000e+00> : vector<256x32xf32>
    %102 = tpu.matmul %100, %101, %cst_38 {dimension_numbers = #tpu.dot_dimension_numbers<[1], [0], [0], [1], [0, 0, 1, 1], [], []>} : vector<256x8xbf16>, vector<8x32xbf16>, vector<256x32xf32> -> vector<256x32xf32>
    %c0_39 = arith.constant 0 : index
    %c0_40 = arith.constant 0 : index
    %103 = vector.load %arg9[%c0_39, %c0_40] : memref<1x32xf32, #tpu.memory_space<vmem>>, vector<1x32xf32>
    %104 = vector.broadcast %103 : vector<1x32xf32> to vector<256x32xf32>
    %105 = arith.mulf %102, %104 : vector<256x32xf32>
    %c0_41 = arith.constant 0 : index
    %c0_42 = arith.constant 0 : index
    %106 = vector.load %arg10[%c0_41, %c0_42] : memref<1x32xf32, #tpu.memory_space<vmem>>, vector<1x32xf32>
    %107 = vector.broadcast %106 : vector<1x32xf32> to vector<256x32xf32>
    %108 = arith.addf %105, %107 : vector<256x32xf32>
    %109 = arith.addf %108, %1 : vector<256x32xf32>
    %cst_43 = arith.constant 0.000000e+00 : f32
    %110 = vector.broadcast %cst_43 : f32 to vector<256x32xf32>
    %111 = arith.maximumf %109, %110 : vector<256x32xf32>
    %c0_44 = arith.constant 0 : index
    %c0_45 = arith.constant 0 : index
    %c0_46 = arith.constant 0 : index
    %112 = vector.load %arg11[%c0_44, %c0_45, %c0_46] : memref<1x256x32xf32, #tpu.memory_space<vmem>>, vector<1x256x32xf32>
    %113 = vector.shape_cast %112 : vector<1x256x32xf32> to vector<256x32xf32>
    %114 = vector.shape_cast %111 : vector<256x32xf32> to vector<1x256x32xf32>
    tpu.vector_store %arg11[%c0_44, %c0_45, %c0_46], %114 {strides = array<i32>} : memref<1x256x32xf32, #tpu.memory_space<vmem>>, vector<1x256x32xf32>,
    return
  }
  func.func @transform_0(%arg0: i32) -> (i32, i32, i32) {
    %c0_i32 = arith.constant 0 : i32
    %c0_i32_0 = arith.constant 0 : i32
    %c0_i32_1 = arith.constant 0 : i32
    return %arg0, %c0_i32, %c0_i32_0 : i32, i32, i32
  }
  func.func @transform_1(%arg0: i32) -> (i32, i32) {
    %c0_i32 = arith.constant 0 : i32
    %c0_i32_0 = arith.constant 0 : i32
    %c0_i32_1 = arith.constant 0 : i32
    return %c0_i32, %c0_i32_0 : i32, i32
  }
  func.func @transform_2(%arg0: i32) -> (i32, i32) {
    %c0_i32 = arith.constant 0 : i32
    %c0_i32_0 = arith.constant 0 : i32
    %c0_i32_1 = arith.constant 0 : i32
    return %c0_i32, %c0_i32_0 : i32, i32
  }
  func.func @transform_3(%arg0: i32) -> (i32, i32) {
    %c0_i32 = arith.constant 0 : i32
    %c0_i32_0 = arith.constant 0 : i32
    %c0_i32_1 = arith.constant 0 : i32
    return %c0_i32, %c0_i32_0 : i32, i32
  }
  func.func @transform_4(%arg0: i32) -> (i32, i32) {
    %c0_i32 = arith.constant 0 : i32
    %c0_i32_0 = arith.constant 0 : i32
    %c0_i32_1 = arith.constant 0 : i32
    return %c0_i32, %c0_i32_0 : i32, i32
  }
  func.func @transform_5(%arg0: i32) -> (i32, i32) {
    %c0_i32 = arith.constant 0 : i32
    %c0_i32_0 = arith.constant 0 : i32
    %c0_i32_1 = arith.constant 0 : i32
    return %c0_i32, %c0_i32_0 : i32, i32
  }
  func.func @transform_6(%arg0: i32) -> (i32, i32) {
    %c0_i32 = arith.constant 0 : i32
    %c0_i32_0 = arith.constant 0 : i32
    %c0_i32_1 = arith.constant 0 : i32
    return %c0_i32, %c0_i32_0 : i32, i32
  }
  func.func @transform_7(%arg0: i32) -> (i32, i32) {
    %c0_i32 = arith.constant 0 : i32
    %c0_i32_0 = arith.constant 0 : i32
    %c0_i32_1 = arith.constant 0 : i32
    return %c0_i32, %c0_i32_0 : i32, i32
  }
  func.func @transform_8(%arg0: i32) -> (i32, i32) {
    %c0_i32 = arith.constant 0 : i32
    %c0_i32_0 = arith.constant 0 : i32
    %c0_i32_1 = arith.constant 0 : i32
    return %c0_i32, %c0_i32_0 : i32, i32
  }
  func.func @transform_9(%arg0: i32) -> (i32, i32) {
    %c0_i32 = arith.constant 0 : i32
    %c0_i32_0 = arith.constant 0 : i32
    %c0_i32_1 = arith.constant 0 : i32
    return %c0_i32, %c0_i32_0 : i32, i32
  }
  func.func @transform_10(%arg0: i32) -> (i32, i32, i32) {
    %c0_i32 = arith.constant 0 : i32
    %c0_i32_0 = arith.constant 0 : i32
    %c0_i32_1 = arith.constant 0 : i32
    return %arg0, %c0_i32, %c0_i32_0 : i32, i32, i32
  }
}

</mosaic_0001>

<bundles_post_ra>
// kernel: tpu_custom_call.1
= control target key start
LH: loop header
LB: loop body
LE: loop exit
PB: predicated region body
PF: predicated region fallthrough
CT: control target
= control target key end

     0   :  { %s3928_s13 = smov 0   ;;  %s6013_s0 = inlined_call_operand.vmem [shape: f32[2,256,32], index: 0, kind: input, shape index: {}]   ;;  %s6014_s1 = inlined_call_operand.vmem [shape: bf16[32,8], index: 1, kind: input, shape index: {}]   ;;  %s6015_s2 = inlined_call_operand.vmem [shape: f32[1,8], index: 2, kind: input, shape index: {}]   ;;  %s6016_s3 = inlined_call_operand.vmem [shape: f32[1,8], index: 3, kind: input, shape index: {}]   ;;  %s6017_s4 = inlined_call_operand.vmem [shape: bf16[8,72], index: 4, kind: input, shape index: {}]   ;;  %s6018_s5 = inlined_call_operand.vmem [shape: f32[1,8], index: 5, kind: input, shape index: {}]   ;;  %s6019_s6 = inlined_call_operand.vmem [shape: f32[1,8], index: 6, kind: input, shape index: {}]   ;;  %s6020_s7 = inlined_call_operand.vmem [shape: bf16[8,32], index: 7, kind: input, shape index: {}]   ;;  %s6021_s8 = inlined_call_operand.vmem [shape: f32[1,32], index: 8, kind: input, shape index: {}]   ;;  %s6022_s9 = inlined_call_operand.vmem [shape: f32[1,32], index: 9, kind: input, shape index: {}]   ;;  %s6023_s10 = inlined_call_operand.vmem [shape: f32[2,256,32], index: 10, kind: output, shape index: {}]  }
   0x1 LB: > { %s3571_s14 = sadd.s32 4294967295, %s3862_s13   ;;  %p3575_p0 = scmp.ge.s32.totalorder %s3862_s13, 1  ;;  %s3862_s13 = sphi %s3928_s13, %s20_s13  }
   0x2   : > { %p312_p1 = scmp.lt.s32.totalorder %s3862_s13, 3 }
   0x4   : > { %p313_p2 = pnand %p3575_p0, %p312_p1 }
   0x6   : > { %316 = sbr.rel (%p313_p2) target bundleno = 1258 (0x4ea), region = 60 }
   0xb   : > { %v3818_v0 = vld [vmem:[%s6014_s1 + $0x8] sm:$0xff]   ;;  %p350_p3 = scmp.lt.s32.totalorder %s3571_s14, 1  ;;  %v3819_v1 = vld [vmem:[%s6014_s1] sm:$0xff]   ;;  %vm811_vm0 = vcmask 1043456   ;;  %vm425_vm1 = vcmask 261120   ;;  %vm762_vm2 = vcmask 64512  }
   0xc   : > { %3692 = vmatprep.subr.bf16.mxu0 %v3818_v0  ;;  %v761_v2 = vld [vmem:[%s6017_s4] sm:$0xf]  ;;  %s3864_s29 = smov 120   ;;  %s3865_s30 = smov 96   ;;  %vm1759_vm3 = vcmask 1046528   ;;  %vm1487_vm4 = vcmask 1040384  }
   0xd   : > { %s6204_s14 = smov (!%p350_p3, %s3571_s14), 1  ;;  %3693 = vmatpush3.bf16.msra.mxu0 %v3818_v0  ;;  %v813_v3 = vsel %vm811_vm0, %v761_v2, 0  ;;  %3799 = vmatprep.subr.msk.bf16.mxu1 %vm811_vm0, %v761_v2  ;;  %v4009_v53 = vld [vmem:[%s6015_s2] ss:$0 sm:$0xff]  ;;  %s3866_s11 = smov 112  }
   0xe   : > { %3694 = vmatprep.subr.bf16.mxu0 %v3819_v1  ;;  %s3638_s21 = sshll.u32 %s6204_s14, 8  ;;  %3797 = vmatpush3.bf16.msra.mxu1 %v813_v3  ;;  %v4016_v58 = vld [vmem:[%s6016_s3] ss:$0 sm:$0xff]  ;;  %s3867_s12 = smov 72  }
   0xf   : > { %s3955_s24 = scalar_lea.vmem %s6013_s0, %s3638_s21  ;;  %s3868_s15 = smov 104  }
  0x10   : > { %v361_v4 = vld [vmem:[%s3955_s24] sm:$0xff]  ;;  %v362_v5 = vld [vmem:[%s3955_s24 + $0x8] sm:$0xff]  ;;  %v363_v6 = vld [vmem:[%s3955_s24 + $0x10] sm:$0xff]  ;;  %s3869_s16 = smov 88   ;;  %s3870_s17 = smov 80  }
  0x11   : > { %3695 = vmatpush3.bf16.msra.mxu0 %v3819_v1  ;;  %v393_v7 = vpack.c.bf16 %v362_v5, %v361_v4  ;;  %v364_v8 = vld [vmem:[%s3955_s24 + $0x18] sm:$0xff]  ;;  %v365_v9 = vld [vmem:[%s3955_s24 + $0x20] sm:$0xff]  ;;  %v366_v10 = vld [vmem:[%s3955_s24 + $0x28] sm:$0xff]  ;;  %s3871_s18 = smov 64   ;;  %s5459_s19 = scalar_lea.vmem %s6023_s10, %s3638_s21 }
  0x12   : > { %v394_v11 = vpack.c.bf16 %v364_v8, %v363_v6  ;;  %v395_v12 = vpack.c.bf16 %v366_v10, %v365_v9  ;;  %3798 = vmatprep.subr.msk.bf16.mxu0 %vm811_vm0, %v761_v2  ;;  %v367_v13 = vld [vmem:[%s3955_s24 + $0x30] sm:$0xff]  ;;  %v368_v14 = vld [vmem:[%s3955_s24 + $0x38] sm:$0xff]  ;;  %v369_v15 = vld [vmem:[%s3955_s24 + $0x40] sm:$0xff] }
  0x13   : > { %3696 = vmatprep.mubr.msk.bf16.mxu0 %vm425_vm1, %v393_v7  ;;  %v370_v16 = vld [vmem:[%s3955_s24 + $0x48] sm:$0xff]  ;;  %v396_v17 = vpack.c.bf16 %v368_v14, %v367_v13  ;;  %v371_v19 = vld [vmem:[%s3955_s24 + $0x50] sm:$0xff]  ;;  %v372_v20 = vld [vmem:[%s3955_s24 + $0x58] sm:$0xff] }
  0x14   : > { %3697 = vmatmul.mubr.msk.bf16.vlgmr.msra.gmra.mxu0 %vm425_vm1, %v394_v11  ;;  %v397_v18 = vpack.c.bf16 %v370_v16, %v369_v15  ;;  %v373_v21 = vld [vmem:[%s3955_s24 + $0x60] sm:$0xff]  ;;  %v374_v22 = vld [vmem:[%s3955_s24 + $0x68] sm:$0xff]  ;;  %v398_v23 = vpack.c.bf16 %v372_v20, %v371_v19  ;;  %v375_v25 = vld [vmem:[%s3955_s24 + $0x70] sm:$0xff] }
  0x15   : > { %3700 = vmatprep.mubr.msk.bf16.mxu0 %vm425_vm1, %v395_v12  ;;  %3729 = vmatpush3.bf16.msra.mxu0 %v813_v3  ;;  %v399_v24 = vpack.c.bf16 %v374_v22, %v373_v21  ;;  %v376_v26 = vld [vmem:[%s3955_s24 + $0x78] sm:$0xff]  ;;  %v377_v27 = vld [vmem:[%s3955_s24 + $0x80] sm:$0xff]  ;;  %v378_v28 = vld [vmem:[%s3955_s24 + $0x88] sm:$0xff] }
  0x16   : > { %v400_v29 = vpack.c.bf16 %v376_v26, %v375_v25  ;;  %v401_v30 = vpack.c.bf16 %v378_v28, %v377_v27  ;;  %v379_v31 = vld [vmem:[%s3955_s24 + $0x90] sm:$0xff]  ;;  %v380_v32 = vld [vmem:[%s3955_s24 + $0x98] sm:$0xff]  ;;  %v381_v33 = vld [vmem:[%s3955_s24 + $0xa0] sm:$0xff] }
  0x17   : > { %v382_v34 = vld [vmem:[%s3955_s24 + $0xa8] sm:$0xff]  ;;  %v402_v35 = vpack.c.bf16 %v380_v32, %v379_v31  ;;  %v383_v37 = vld [vmem:[%s3955_s24 + $0xb0] sm:$0xff]  ;;  %v384_v38 = vld [vmem:[%s3955_s24 + $0xb8] sm:$0xff] }
  0x18   : > { %v403_v36 = vpack.c.bf16 %v382_v34, %v381_v33  ;;  %v385_v39 = vld [vmem:[%s3955_s24 + $0xc0] sm:$0xff]  ;;  %v386_v40 = vld [vmem:[%s3955_s24 + $0xc8] sm:$0xff]  ;;  %v404_v41 = vpack.c.bf16 %v384_v38, %v383_v37  ;;  %v387_v43 = vld [vmem:[%s3955_s24 + $0xd0] sm:$0xff] }
  0x19   : > { %v405_v42 = vpack.c.bf16 %v386_v40, %v385_v39  ;;  %v388_v44 = vld [vmem:[%s3955_s24 + $0xd8] sm:$0xff]  ;;  %v389_v45 = vld [vmem:[%s3955_s24 + $0xe0] sm:$0xff]  ;;  %v390_v46 = vld [vmem:[%s3955_s24 + $0xe8] sm:$0xff] }
  0x1a   : > { %v406_v47 = vpack.c.bf16 %v388_v44, %v387_v43  ;;  %v407_v48 = vpack.c.bf16 %v390_v46, %v389_v45  ;;  %v391_v49 = vld [vmem:[%s3955_s24 + $0xf0] sm:$0xff]  ;;  %v392_v50 = vld [vmem:[%s3955_s24 + $0xf8] sm:$0xff] }
  0x1b   : > { %v408_v51 = vpack.c.bf16 %v392_v50, %v391_v49 }
  0x1c   : > { %3701 = vmatmul.mubr.msk.bf16.gmra.mxu0 %vm425_vm1, %v396_v17 }
  0x1d   : > { %3704 = vmatprep.mubr.msk.bf16.mxu0 %vm425_vm1, %v397_v18 }
  0x24   : > { %3705 = vmatmul.mubr.msk.bf16.gmra.mxu0 %vm425_vm1, %v398_v23 }
  0x25   : > { %3708 = vmatprep.mubr.msk.bf16.mxu0 %vm425_vm1, %v399_v24 }
  0x2c   : > { %3709 = vmatmul.mubr.msk.bf16.gmra.mxu0 %vm425_vm1, %v400_v29 }
  0x2d   : > { %3712 = vmatprep.mubr.msk.bf16.mxu0 %vm425_vm1, %v401_v30 }
  0x34   : > { %3713 = vmatmul.mubr.msk.bf16.gmra.mxu0 %vm425_vm1, %v402_v35 }
  0x35   : > { %3716 = vmatprep.mubr.msk.bf16.mxu0 %vm425_vm1, %v403_v36 }
  0x3c   : > { %3717 = vmatmul.mubr.msk.bf16.gmra.mxu0 %vm425_vm1, %v404_v41 }
  0x3d   : > { %3720 = vmatprep.mubr.msk.bf16.mxu0 %vm425_vm1, %v405_v42 }
  0x44   : > { %3721 = vmatmul.mubr.msk.bf16.gmra.mxu0 %vm425_vm1, %v406_v47 }
  0x45   : > { %3724 = vmatprep.mubr.msk.bf16.mxu0 %vm425_vm1, %v407_v48 }
  0x4c   : > { %3725 = vmatmul.mubr.msk.bf16.gmra.mxu0 %vm425_vm1, %v408_v51 }
  0xd4   : > { %v3698_v52 = vpop.f32.mrf.mxu0 }
  0xd5   : > { %v644_v56 = vmul.f32 %v3698_v52, %v4009_v53 }
  0xd6   : > { %v508_v54 = vpop.f32.mrf.mxu0 }
  0xd7   : > { %v642_v55 = vmul.f32 %v4009_v53, %v508_v54  ;;  %v683_v0 = vadd.f32 %v4016_v58, %v644_v56 }
  0xd8   : > { %v3699_v57 = vpop.f32.mrf.mxu0 }
  0xd9   : > { %v645_v59 = vmul.f32 %v3699_v57, %v4009_v53  ;;  %v681_v61 = vadd.f32 %v4016_v58, %v642_v55  ;;  %v715_v9 = vmax.f32 %v683_v0, 0.0 }
  0xda   : > { %v511_v60 = vpop.f32.mrf.mxu0 }
  0xdb   : > { %v684_v62 = vadd.f32 %v4016_v58, %v645_v59  ;;  %v643_v63 = vmul.f32 %v4009_v53, %v511_v60  ;;  %v713_v6 = vmax.f32 %v681_v61, 0.0 }
  0xdc   : > { %v3702_v1 = vpop.f32.mrf.mxu0 }
  0xdd   : > { %v682_v2 = vadd.f32 %v4016_v58, %v643_v63  ;;  %v648_v3 = vmul.f32 %v3702_v1, %v4009_v53  ;;  %v716_v4 = vmax.f32 %v684_v62, 0.0 }
  0xde   : > { %v524_v5 = vpop.f32.mrf.mxu0 }
  0xdf   : > { %v714_v7 = vmax.f32 %v682_v2, 0.0  ;;  %v646_v8 = vmul.f32 %v4009_v53, %v524_v5  ;;  %v687_v10 = vadd.f32 %v4016_v58, %v648_v3  ;;  %v746_v15 = vpack.c.bf16 %v716_v4, %v715_v9 }
  0xe0   : > { %v3703_v11 = vpop.f32.mrf.mxu0 }
  0xe1   : > { %v745_v12 = vpack.c.bf16 %v714_v7, %v713_v6  ;;  %v685_v13 = vadd.f32 %v4016_v58, %v646_v8  ;;  %v649_v14 = vmul.f32 %v3703_v11, %v4009_v53  ;;  %v719_v19 = vmax.f32 %v687_v10, 0.0 }
  0xe2   : > { %v527_v16 = vpop.f32.mrf.mxu0 }
  0xe3   : > { %v688_v17 = vadd.f32 %v4016_v58, %v649_v14  ;;  %v647_v18 = vmul.f32 %v4009_v53, %v527_v16  ;;  %3730 = vmatprep.mubr.msk.bf16.mxu0 %vm762_vm2, %v745_v12  ;;  %v717_v21 = vmax.f32 %v685_v13, 0.0 }
  0xe4   : > { %3731 = vmatmul.mubr.msk.bf16.vlgmr.msra.gmra.mxu0 %vm762_vm2, %v746_v15  ;;  %v3706_v20 = vpop.f32.mrf.mxu0 }
  0xe5   : > { %v720_v22 = vmax.f32 %v688_v17, 0.0  ;;  %v686_v23 = vadd.f32 %v4016_v58, %v647_v18  ;;  %v652_v24 = vmul.f32 %v3706_v20, %v4009_v53 }
  0xe6   : > { %v540_v25 = vpop.f32.mrf.mxu0 }
  0xe7   : > { %v718_v26 = vmax.f32 %v686_v23, 0.0  ;;  %v650_v27 = vmul.f32 %v4009_v53, %v540_v25  ;;  %v748_v28 = vpack.c.bf16 %v720_v22, %v719_v19  ;;  %v691_v29 = vadd.f32 %v4016_v58, %v652_v24 }
  0xe8   : > { %v3707_v30 = vpop.f32.mrf.mxu0 }
  0xe9   : > { %v747_v31 = vpack.c.bf16 %v718_v26, %v717_v21  ;;  %v689_v32 = vadd.f32 %v4016_v58, %v650_v27  ;;  %v653_v33 = vmul.f32 %v3707_v30, %v4009_v53  ;;  %v723_v37 = vmax.f32 %v691_v29, 0.0 }
  0xea   : > { %v543_v34 = vpop.f32.mrf.mxu0 }
  0xeb   : > { %3734 = vmatprep.mubr.msk.bf16.mxu0 %vm762_vm2, %v747_v31  ;;  %v692_v35 = vadd.f32 %v4016_v58, %v653_v33  ;;  %v651_v36 = vmul.f32 %v4009_v53, %v543_v34  ;;  %v721_v39 = vmax.f32 %v689_v32, 0.0 }
  0xec   : > { %3735 = vmatmul.mubr.msk.bf16.gmra.mxu0 %vm762_vm2, %v748_v28  ;;  %v3710_v38 = vpop.f32.mrf.mxu0 }
  0xed   : > { %v724_v40 = vmax.f32 %v692_v35, 0.0  ;;  %v690_v41 = vadd.f32 %v4016_v58, %v651_v36  ;;  %v656_v42 = vmul.f32 %v3710_v38, %v4009_v53 }
  0xee   : > { %v556_v43 = vpop.f32.mrf.mxu0 }
  0xef   : > { %v722_v44 = vmax.f32 %v690_v41, 0.0  ;;  %v654_v45 = vmul.f32 %v4009_v53, %v556_v43  ;;  %v750_v46 = vpack.c.bf16 %v724_v40, %v723_v37  ;;  %v695_v47 = vadd.f32 %v4016_v58, %v656_v42 }
  0xf0   : > { %v3711_v48 = vpop.f32.mrf.mxu0 }
  0xf1   : > { %v749_v49 = vpack.c.bf16 %v722_v44, %v721_v39  ;;  %v693_v50 = vadd.f32 %v4016_v58, %v654_v45  ;;  %v657_v51 = vmul.f32 %v3711_v48, %v4009_v53  ;;  %v727_v56 = vmax.f32 %v695_v47, 0.0 }
  0xf2   : > { %v559_v52 = vpop.f32.mrf.mxu0 }
  0xf3   : > { %3738 = vmatprep.mubr.msk.bf16.mxu0 %vm762_vm2, %v749_v49  ;;  %v696_v54 = vadd.f32 %v4016_v58, %v657_v51  ;;  %v655_v55 = vmul.f32 %v4009_v53, %v559_v52  ;;  %v725_v59 = vmax.f32 %v693_v50, 0.0 }
  0xf4   : > { %3739 = vmatmul.mubr.msk.bf16.gmra.mxu0 %vm762_vm2, %v750_v46  ;;  %v3714_v57 = vpop.f32.mrf.mxu0 }
  0xf5   : > { %v728_v60 = vmax.f32 %v696_v54, 0.0  ;;  %v694_v61 = vadd.f32 %v4016_v58, %v655_v55  ;;  %v660_v62 = vmul.f32 %v3714_v57, %v4009_v53 }
  0xf6   : > { %v572_v63 = vpop.f32.mrf.mxu0 }
  0xf7   : > { %v726_v0 = vmax.f32 %v694_v61, 0.0  ;;  %v658_v1 = vmul.f32 %v4009_v53, %v572_v63  ;;  %v752_v2 = vpack.c.bf16 %v728_v60, %v727_v56  ;;  %v699_v3 = vadd.f32 %v4016_v58, %v660_v62 }
  0xf8   : > { %v3715_v4 = vpop.f32.mrf.mxu0 }
  0xf9   : > { %v751_v5 = vpack.c.bf16 %v726_v0, %v725_v59  ;;  %v697_v6 = vadd.f32 %v4016_v58, %v658_v1  ;;  %v661_v7 = vmul.f32 %v3715_v4, %v4009_v53  ;;  %v731_v11 = vmax.f32 %v699_v3, 0.0 }
  0xfa   : > { %v575_v8 = vpop.f32.mrf.mxu0 }
  0xfb   : > { %3742 = vmatprep.mubr.msk.bf16.mxu1 %vm762_vm2, %v751_v5  ;;  %v700_v9 = vadd.f32 %v4016_v58, %v661_v7  ;;  %v659_v10 = vmul.f32 %v4009_v53, %v575_v8  ;;  %v729_v13 = vmax.f32 %v697_v6, 0.0 }
  0xfc   : > { %3743 = vmatmul.mubr.msk.bf16.vlgmr.msra.gmra.mxu1 %vm762_vm2, %v752_v2  ;;  %v3718_v12 = vpop.f32.mrf.mxu0 }
  0xfd   : > { %v732_v14 = vmax.f32 %v700_v9, 0.0  ;;  %v698_v15 = vadd.f32 %v4016_v58, %v659_v10  ;;  %v664_v16 = vmul.f32 %v3718_v12, %v4009_v53 }
  0xfe   : > { %v588_v17 = vpop.f32.mrf.mxu0 }
  0xff   : > { %v730_v18 = vmax.f32 %v698_v15, 0.0  ;;  %v662_v19 = vmul.f32 %v4009_v53, %v588_v17  ;;  %v754_v20 = vpack.c.bf16 %v732_v14, %v731_v11  ;;  %v703_v21 = vadd.f32 %v4016_v58, %v664_v16 }
 0x100   : > { %v3719_v22 = vpop.f32.mrf.mxu0 }
 0x101   : > { %v753_v23 = vpack.c.bf16 %v730_v18, %v729_v13  ;;  %v701_v24 = vadd.f32 %v4016_v58, %v662_v19  ;;  %v665_v25 = vmul.f32 %v3719_v22, %v4009_v53  ;;  %v735_v29 = vmax.f32 %v703_v21, 0.0 }
 0x102   : > { %v591_v26 = vpop.f32.mrf.mxu0 }
 0x103   : > { %3746 = vmatprep.mubr.msk.bf16.mxu1 %vm762_vm2, %v753_v23  ;;  %v704_v27 = vadd.f32 %v4016_v58, %v665_v25  ;;  %v663_v28 = vmul.f32 %v4009_v53, %v591_v26  ;;  %v733_v31 = vmax.f32 %v701_v24, 0.0 }
 0x104   : > { %3747 = vmatmul.mubr.msk.bf16.gmra.mxu1 %vm762_vm2, %v754_v20  ;;  %v3722_v30 = vpop.f32.mrf.mxu0  ;;  %v976_v20 = vlaneseq }
 0x105   : > { %v736_v32 = vmax.f32 %v704_v27, 0.0  ;;  %v702_v33 = vadd.f32 %v4016_v58, %v663_v28  ;;  %v668_v34 = vmul.f32 %v3722_v30, %v4009_v53 }
 0x106   : > { %v604_v35 = vpop.f32.mrf.mxu0  ;;  %v4135_v23 = vshrl.u32 %v976_v20, 7 }
 0x107   : > { %v734_v36 = vmax.f32 %v702_v33, 0.0  ;;  %v666_v37 = vmul.f32 %v4009_v53, %v604_v35  ;;  %v756_v38 = vpack.c.bf16 %v736_v32, %v735_v29  ;;  %v707_v39 = vadd.f32 %v4016_v58, %v668_v34 }
 0x108   : > { %v3723_v40 = vpop.f32.mrf.mxu0  ;;  %v978_v26 = vadd.s32 8, %v4135_v23  ;;  %v1013_v33 = vand.u32 15, %v4135_v23 }
 0x109   : > { %v755_v41 = vpack.c.bf16 %v734_v36, %v733_v31  ;;  %v705_v42 = vadd.f32 %v4016_v58, %v666_v37  ;;  %v669_v43 = vmul.f32 %v3723_v40, %v4009_v53  ;;  %v739_v47 = vmax.f32 %v707_v39, 0.0 }
 0x10a   : > { %v607_v44 = vpop.f32.mrf.mxu0  ;;  %v1020_v28 = vand.u32 15, %v978_v26  ;;  %vm4168_vm6 = vcmp.eq.s32.totalorder %v1013_v33, 0  ;;  %v980_v37 = vadd.s32 24, %v4135_v23 }
 0x10b   : > { %v708_v45 = vadd.f32 %v4016_v58, %v669_v43  ;;  %v667_v46 = vmul.f32 %v4009_v53, %v607_v44  ;;  %3750 = vmatprep.mubr.msk.bf16.mxu1 %vm762_vm2, %v755_v41  ;;  %v737_v49 = vmax.f32 %v705_v42, 0.0 }
 0x10c   : > { %v3726_v48 = vpop.f32.mrf.mxu0  ;;  %3751 = vmatmul.mubr.msk.bf16.gmra.mxu1 %vm762_vm2, %v756_v38  ;;  %vm4154_vm5 = vcmp.eq.s32.totalorder %v1020_v28, 15  ;;  %v1034_v40 = vand.u32 15, %v980_v37 }
 0x10d   : > { %v740_v50 = vmax.f32 %v708_v45, 0.0  ;;  %v706_v51 = vadd.f32 %v4016_v58, %v667_v46  ;;  %v672_v52 = vmul.f32 %v3726_v48, %v4009_v53  ;;  %v979_v46 = vadd.s32 16, %v4135_v23 }
 0x10e   : > { %v620_v54 = vpop.f32.mrf.mxu0  ;;  %vm4188_vm7 = vcmp.eq.s32.totalorder %v1034_v40, 15 }
 0x10f   : > { %v738_v55 = vmax.f32 %v706_v51, 0.0  ;;  %v670_v56 = vmul.f32 %v4009_v53, %v620_v54  ;;  %v758_v57 = vpack.c.bf16 %v740_v50, %v739_v47  ;;  %v711_v59 = vadd.f32 %v4016_v58, %v672_v52 }
 0x110   : > { %v3727_v60 = vpop.f32.mrf.mxu0  ;;  %v1027_v48 = vand.u32 15, %v979_v46 }
 0x111   : > { %v757_v61 = vpack.c.bf16 %v738_v55, %v737_v49  ;;  %v709_v62 = vadd.f32 %v4016_v58, %v670_v56  ;;  %v673_v63 = vmul.f32 %v3727_v60, %v4009_v53  ;;  %v743_v3 = vmax.f32 %v711_v59, 0.0 }
 0x112   : > { %v623_v0 = vpop.f32.mrf.mxu0  ;;  %vm4214_vm8 = vcmp.eq.s32.totalorder %v1027_v48, 0 }
 0x113   : > { %v712_v1 = vadd.f32 %v4016_v58, %v673_v63  ;;  %v671_v2 = vmul.f32 %v4009_v53, %v623_v0  ;;  %3754 = vmatprep.mubr.msk.bf16.mxu1 %vm762_vm2, %v757_v61  ;;  %v741_v4 = vmax.f32 %v709_v62, 0.0 }
 0x114   : > { %3755 = vmatmul.mubr.msk.bf16.gmra.mxu1 %vm762_vm2, %v758_v57 }
 0x115   : > { %v744_v5 = vmax.f32 %v712_v1, 0.0  ;;  %v710_v6 = vadd.f32 %v4016_v58, %v671_v2  ;;  %v982_v1 = vadd.s32 40, %v4135_v23 }
 0x117   : > { %v742_v7 = vmax.f32 %v710_v6, 0.0  ;;  %v760_v8 = vpack.c.bf16 %v744_v5, %v743_v3  ;;  %v1048_v5 = vand.u32 15, %v982_v1 }
 0x119   : > { %v759_v9 = vpack.c.bf16 %v742_v7, %v741_v4  ;;  %v3129_v4 = vld [vmem:[%s6020_s7] sm:$0xf]  ;;  %vm4275_vm9 = vcmp.eq.s32.totalorder %v1048_v5, 15 }
 0x11a   : > { %3800 = vmatprep.subr.msk.bf16.mxu1 %vm811_vm0, %v3129_v4  ;;  %v3179_v6 = vsel %vm811_vm0, %v3129_v4, 0 }
 0x11b   : > { %3758 = vmatprep.mubr.msk.bf16.mxu1 %vm762_vm2, %v759_v9  ;;  %3763 = vmatpush3.bf16.msra.mxu1 %v3179_v6  ;;  %v981_v9 = vadd.s32 32, %v4135_v23 }
 0x11c   : > { %3759 = vmatmul.mubr.msk.bf16.gmra.mxu1 %vm762_vm2, %v760_v8 }
 0x1a4   : > { %v3732_v10 = vpop.f32.mrf.mxu0 }
 0x1a5   : > { %1642 = vrot.lane.b32.xlu1 %v3732_v10, %s3864_s29  ;;  %v1763_v15 = vrot.slane %v3732_v10, 1  ;;  %v1491_v18 = vrot.slane %v3732_v10, 7 }
 0x1a6   : > { %v849_v53 = vpop.f32.mrf.mxu0 }
 0x1a7   : > { %1638 = vrot.lane.b32.xlu0 %v849_v53, %s3864_s29  ;;  %v1760_v11 = vrot.slane %v849_v53, 1  ;;  %v4111_v13 = vrot.slane %v849_v53, 7 }
 0x1a8   : > { %v4101_v58 = vpop.f32.mrf.mxu0 }
 0x1a9   : > { %2147 = vrot.lane.b32.xlu1 %v3732_v10, %s3865_s30  ;;  %v1765_v14 = vrot.slane %v4101_v58, 1  ;;  %v1493_v16 = vrot.slane %v4101_v58, 7 }
 0x1aa   : > { %v852_v12 = vpop.f32.mrf.mxu0 }
 0x1ab   : > { %1821 = vrot.lane.b32.xlu0 %v1760_v11, %s3866_s11  ;;  %v1766_v17 = vsel %vm1759_vm3, %v1763_v15, %v1765_v14  ;;  %v4121_v19 = vsel %vm1487_vm4, %v1491_v18, %v1493_v16  ;;  %v1761_v21 = vrot.slane %v852_v12, 1  ;;  %v1489_v24 = vrot.slane %v852_v12, 7 }
 0x1ac   : > { %v4129_v22 = vpop.f32.mrf.mxu0 }
 0x1ad   : > { %2693 = vrot.lane.b32.xlu1 %v3732_v10, %s3867_s12  ;;  %v1764_v25 = vsel %vm1759_vm3, %v1761_v21, %v1763_v15  ;;  %v4144_v27 = vsel %vm1487_vm4, %v4111_v13, %v1489_v24  ;;  %v1762_v29 = vsel %vm1759_vm3, %v1760_v11, %v1761_v21  ;;  %v4159_v32 = vsel %vm1487_vm4, %v1489_v24, %v1491_v18 }
 0x1ae   : > { %v4150_v30 = vpop.f32.mrf.mxu0  ;;  %v2307_v34 = vsel %vm4154_vm5, 0.0, %v1764_v25  ;;  %v2502_v38 = vsel %vm4168_vm6, 0.0, %v4159_v32  ;;  %v1499_v50 = vrot.slane %v4129_v22, 7  ;;  %v1771_v55 = vrot.slane %v4129_v22, 1 }
 0x1af   : > { %2149 = vrot.lane.b32.xlu0 %v4101_v58, %s3865_s30  ;;  %v1767_v39 = vrot.slane %v4150_v30, 1  ;;  %v1495_v44 = vrot.slane %v4150_v30, 7  ;;  %v1041_v11 = vand.u32 15, %v981_v9 }
 0x1b0   : > { %v4172_v36 = vpop.f32.mrf.mxu0 }
 0x1b1   : > { %2143 = vrot.lane.b32.xlu1 %v849_v53, %s3865_s30  ;;  %v1768_v41 = vsel %vm1759_vm3, %v1765_v14, %v1767_v39  ;;  %v4203_v47 = vsel %vm1487_vm4, %v1493_v16, %v1495_v44  ;;  %v1501_v51 = vrot.slane %v4172_v36, 7  ;;  %v1773_v56 = vrot.slane %v4172_v36, 1 }
 0x1b2   : > { %v2309_v43 = vsel %vm4188_vm7, 0.0, %v1768_v41  ;;  %v868_v45 = vpop.f32.mrf.mxu0  ;;  %v2819_v49 = vsel %vm4154_vm5, 0.0, %v1768_v41  ;;  %v2504_v54 = vsel %vm4214_vm8, 0.0, %v4203_v47  ;;  %vm4290_vm10 = vcmp.eq.s32.totalorder %v1041_v11, 0 }
 0x1b3   : > { %2695 = vrot.lane.b32.xlu0 %v4101_v58, %s3867_s12  ;;  %v4227_v57 = vsel %vm1487_vm4, %v1499_v50, %v1501_v51  ;;  %v1774_v59 = vsel %vm1759_vm3, %v1771_v55, %v1773_v56  ;;  %v1769_v61 = vrot.slane %v868_v45, 1  ;;  %v1497_v63 = vrot.slane %v868_v45, 7 }
 0x1b4   : > { %6071 = vst [vmem:[#allocation2_spill] sm:$0xff] %v4227_v57  ;;  %v4236_v60 = vpop.f32.mrf.mxu0 }
 0x1b5   : > { %1644 = vrot.lane.b32.xlu1 %v4101_v58, %s3864_s29  ;;  %v1772_v62 = vsel %vm1759_vm3, %v1769_v61, %v1771_v55  ;;  %v4246_v0 = vsel %vm1487_vm4, %v1495_v44, %v1497_v63  ;;  %v1770_v2 = vsel %vm1759_vm3, %v1767_v39, %v1769_v61  ;;  %v4267_v7 = vsel %vm1487_vm4, %v1497_v63, %v1499_v50 }
 0x1b6   : > { %v4257_v3 = vpop.f32.mrf.mxu0  ;;  %v2821_v8 = vsel %vm4188_vm7, 0.0, %v1772_v62  ;;  %v2311_v53 = vsel %vm4275_vm9, 0.0, %v1772_v62  ;;  %v2506_v18 = vsel %vm4290_vm10, 0.0, %v4267_v7 }
 0x1b7   : > { %1640 = vrot.lane.b32.xlu0 %v852_v12, %s3864_s29  ;;  %v1775_v21 = vrot.slane %v4257_v3, 1  ;;  %v1503_v37 = vrot.slane %v4257_v3, 7 }
 0x1b8   : > { %v4288_v14 = vpop.f32.mrf.mxu0 }
 0x1b9   : > { %1982 = vrot.lane.b32.xlu1 %v4111_v13, %s3868_s15  ;;  %v1776_v26 = vsel %vm1759_vm3, %v1773_v56, %v1775_v21  ;;  %v6024_v50 = vrot.slane %v4288_v14, 7  ;;  %v1779_v56 = vrot.slane %v4236_v60, 1 }
 0x1ba   : > { %v4338_v39 = vpop.f32.mrf.mxu0 }
 0x1bb   : > { %2145 = vrot.lane.b32.xlu0 %v852_v12, %s3865_s30  ;;  %v1777_v6 = vrot.slane %v4338_v39, 1 }
 0x1bc   : > { %v4401_v5 = vpop.f32.mrf.mxu1 }
 0x1bd   : > { %1827 = vrot.lane.b32.xlu1 %v1766_v17, %s3866_s11  ;;  %v1780_v11 = vsel %vm1759_vm3, %v1777_v6, %v1779_v56 }
 0x1bf   : > { %1988 = vrot.lane.b32.xlu0 %v4121_v19, %s3868_s15 }
 0x1c1   : > { %2374 = vrot.lane.b32.xlu1 %v1766_v17, %s3869_s16 }
 0x1c3   : > { %2567 = vrot.lane.b32.xlu0 %v4121_v19, %s3870_s17 }
 0x1c5   : > { %2878 = vrot.lane.b32.xlu1 %v1766_v17, %s3871_s18  ;;  %v984_v17 = vadd.s32 56, %v4135_v23 }
 0x1c7   : > { %1650 = vrot.lane.b32.xlu0 %v4129_v22, %s3864_s29  ;;  %v1062_v24 = vand.u32 15, %v984_v17 }
 0x1c9   : > { %2155 = vrot.lane.b32.xlu1 %v4129_v22, %s3865_s30  ;;  %vm4320_vm11 = vcmp.eq.s32.totalorder %v1062_v24, 15 }
 0x1ca   : > { %v2313_v33 = vsel %vm4320_vm11, 0.0, %v1776_v26 }
 0x1cb   : > { %1825 = vrot.lane.b32.xlu0 %v1764_v25, %s3866_s11 }
 0x1cd   : > { %2701 = vrot.lane.b32.xlu1 %v4129_v22, %s3867_s12 }
 0x1cf   : > { %1984 = vrot.lane.b32.xlu0 %v4144_v27, %s3868_s15 }
 0x1d1   : > { %1823 = vrot.lane.b32.xlu1 %v1762_v29, %s3866_s11 }
 0x1d3   : > { %1646 = vrot.lane.b32.xlu0 %v4150_v30, %s3864_s29 }
 0x1d5   : > { %1986 = vrot.lane.b32.xlu1 %v4159_v32, %s3868_s15 }
 0x1d7   : > { %2372 = vrot.lane.b32.xlu0 %v2307_v34, %s3869_s16 }
 0x1d9   : > { %2370 = vrot.lane.b32.xlu1 %v1762_v29, %s3869_s16 }
 0x1db   : > { %2157 = vrot.lane.b32.xlu0 %v4172_v36, %s3865_s30 }
 0x1dd   : > { %2565 = vrot.lane.b32.xlu1 %v2502_v38, %s3870_s17 }
 0x1df   : > { %2703 = vrot.lane.b32.xlu0 %v4172_v36, %s3867_s12 }
 0x1e1   : > { %2697 = vrot.lane.b32.xlu1 %v4150_v30, %s3867_s12 }
 0x1e3   : > { %1829 = vrot.lane.b32.xlu0 %v1768_v41, %s3866_s11  ;;  %v983_v41 = vadd.s32 48, %v4135_v23 }
 0x1e5   : > { %2151 = vrot.lane.b32.xlu1 %v4150_v30, %s3865_s30  ;;  %v1055_v46 = vand.u32 15, %v983_v41  ;;  %v986_v41 = vadd.s32 72, %v4135_v23 }
 0x1e7   : > { %2376 = vrot.lane.b32.xlu0 %v2309_v43, %s3869_s16  ;;  %v4346_v43 = vsel %vm1487_vm4, %v1501_v51, %v1503_v37  ;;  %vm4367_vm12 = vcmp.eq.s32.totalorder %v1055_v46, 0 }
 0x1e8   : > { %6078 = vst [vmem:[#allocation3_spill] sm:$0xff] %v4346_v43  ;;  %v2508_v55 = vsel %vm4367_vm12, 0.0, %v4346_v43 }
 0x1e9   : > { %1652 = vrot.lane.b32.xlu1 %v4172_v36, %s3864_s29  ;;  %v2823_v36 = vsel %vm4275_vm9, 0.0, %v1776_v26 }
 0x1eb   : > { %2699 = vrot.lane.b32.xlu0 %v868_v45, %s3867_s12 }
 0x1ed   : > { %1990 = vrot.lane.b32.xlu1 %v4203_v47, %s3868_s15 }
 0x1ef   : > { %2153 = vrot.lane.b32.xlu0 %v868_v45, %s3865_s30 }
 0x1f1   : > { %1648 = vrot.lane.b32.xlu1 %v868_v45, %s3864_s29 }
 0x1f3   : > { %2880 = vrot.lane.b32.xlu0 %v2819_v49, %s3871_s18  ;;  %v1507_v49 = vrot.slane %v4236_v60, 7 }
 0x1f5   : > { %2569 = vrot.lane.b32.xlu1 %v2504_v54, %s3870_s17 }
 0x1f7   : > { %1996 = vrot.lane.b32.xlu0 %v4227_v57, %s3868_s15 }
 0x1f9   : > { %1835 = vrot.lane.b32.xlu1 %v1774_v59, %s3866_s11 }
 0x1fb   : > { %2575 = vrot.lane.b32.xlu0 %v4227_v57, %s3870_s17 }
 0x1fd   : > { %2382 = vrot.lane.b32.xlu1 %v1774_v59, %s3869_s16 }
 0x1ff   : > { %1658 = vrot.lane.b32.xlu0 %v4236_v60, %s3864_s29 }
 0x201   : > { %2886 = vrot.lane.b32.xlu1 %v1774_v59, %s3871_s18  ;;  %v6025_v59 = vrot.slane %v4288_v14, 1 }
 0x203   : > { %1833 = vrot.lane.b32.xlu0 %v1772_v62, %s3866_s11  ;;  %v4382_v62 = vsel %vm1487_vm4, %v1507_v49, %v6024_v50 }
 0x204   : > { %6081 = vst [vmem:[#allocation4_spill] sm:$0xff] %v4382_v62 }
 0x205   : > { %2163 = vrot.lane.b32.xlu1 %v4236_v60, %s3865_s30 }
 0x207   : > { %1992 = vrot.lane.b32.xlu0 %v4246_v0, %s3868_s15 }
 0x209   : > { %2709 = vrot.lane.b32.xlu1 %v4236_v60, %s3867_s12  ;;  %v1782_v60 = vsel %vm1759_vm3, %v1779_v56, %v6025_v59  ;;  %v985_v59 = vadd.s32 64, %v4135_v23 }
 0x20b   : > { %2571 = vrot.lane.b32.xlu0 %v4246_v0, %s3870_s17 }
 0x20d   : > { %1831 = vrot.lane.b32.xlu1 %v1770_v2, %s3866_s11 }
 0x20f   : > { %1654 = vrot.lane.b32.xlu0 %v4257_v3, %s3864_s29 }
 0x211   : > { %1994 = vrot.lane.b32.xlu1 %v4267_v7, %s3868_s15 }
 0x213   : > { %2884 = vrot.lane.b32.xlu0 %v2821_v8, %s3871_s18 }
 0x215   : > { %2882 = vrot.lane.b32.xlu1 %v1770_v2, %s3871_s18 }
 0x217   : > { %v4282_v58 = vpop.permute.xlu1 %1642  ;;  %2380 = vrot.lane.b32.xlu0 %v2311_v53, %s3869_s16  ;;  %v1505_v53 = vrot.slane %v4338_v39, 7 }
 0x219   : > { %v4285_v12 = vpop.permute.xlu0 %1638  ;;  %2378 = vrot.lane.b32.xlu1 %v1770_v2, %s3869_s16  ;;  %v4419_v24 = vsel %vm1487_vm4, %v1503_v37, %v1505_v53  ;;  %v1778_v37 = vsel %vm1759_vm3, %v1775_v21, %v1777_v6  ;;  %v4442_v50 = vsel %vm1487_vm4, %v1505_v53, %v1507_v49 }
 0x21a   : > { %6083 = vst [vmem:[#allocation6_spill] sm:$0xff] %v4419_v24  ;;  %6084 = vst [vmem:[#allocation7_spill] sm:$0xff] %v4442_v50 }
 0x21b   : > { %v4294_v16 = vpop.permute.xlu1 %2147  ;;  %2165 = vrot.lane.b32.xlu0 %v4288_v14, %s3865_s30 }
 0x21d   : > { %v4302_v20 = vpop.permute.xlu0 %1821  ;;  %2573 = vrot.lane.b32.xlu1 %v2506_v18, %s3870_s17 }
 0x21e   : > { %v1914_v6 = vsel %vm1759_vm3, 0.0, %v4302_v20 }
 0x21f   : > { %v4306_v22 = vpop.permute.xlu1 %2693  ;;  %2711 = vrot.lane.b32.xlu0 %v4288_v14, %s3867_s12  ;;  %v1915_v53 = vsel %vm4154_vm5, 0.0, %v1914_v6 }
 0x221   : > { %v4310_v25 = vpop.permute.xlu0 %2149  ;;  %2705 = vrot.lane.b32.xlu1 %v4257_v3, %s3867_s12 }
 0x223   : > { %v4317_v28 = vpop.permute.xlu1 %2143  ;;  %1837 = vrot.lane.b32.xlu0 %v1776_v26, %s3866_s11 }
 0x225   : > { %v4324_v30 = vpop.permute.xlu0 %2695  ;;  %2159 = vrot.lane.b32.xlu1 %v4257_v3, %s3865_s30 }
 0x227   : > { %v4330_v34 = vpop.permute.xlu1 %1644  ;;  %2384 = vrot.lane.b32.xlu0 %v2313_v33, %s3869_s16 }
 0x229   : > { %v4334_v38 = vpop.permute.xlu0 %1640  ;;  %1660 = vrot.lane.b32.xlu1 %v4288_v14, %s3864_s29 }
 0x22b   : > { %v1983_v40 = vpop.permute.xlu1 %1982  ;;  %2707 = vrot.lane.b32.xlu0 %v4338_v39, %s3867_s12 }
 0x22d   : > { %v4348_v44 = vpop.permute.xlu0 %2145  ;;  %1998 = vrot.lane.b32.xlu1 %v4346_v43, %s3868_s15  ;;  %v1069_v43 = vand.u32 15, %v985_v59  ;;  %v988_v59 = vadd.s32 88, %v4135_v23 }
 0x22f   : > { %v4352_v45 = vpop.permute.xlu1 %1827  ;;  %2161 = vrot.lane.b32.xlu0 %v4338_v39, %s3865_s30  ;;  %vm4479_vm14 = vcmp.eq.s32.totalorder %v1069_v43, 0 }
 0x231   : > { %v4356_v48 = vpop.permute.xlu0 %1988  ;;  %1656 = vrot.lane.b32.xlu1 %v4338_v39, %s3864_s29 }
 0x233   : > { %v4364_v51 = vpop.permute.xlu1 %2374  ;;  %2888 = vrot.lane.b32.xlu0 %v2823_v36, %s3871_s18  ;;  %v4436_v36 = vpop.f32.mrf.mxu1 }
 0x234   : > { %v6030_v43 = vrot.slane %v4436_v36, 1 }
 0x235   : > { %v4376_v61 = vpop.permute.xlu0 %2567  ;;  %2577 = vrot.lane.b32.xlu1 %v2508_v55, %s3870_s17  ;;  %v2078_v55 = vsel %vm1487_vm4, 0.0, %v1983_v40  ;;  %v2825_v40 = vsel %vm4320_vm11, 0.0, %v1780_v11  ;;  %v4476_v31 = vpop.f32.mrf.mxu1 }
 0x236   : > { %v2079_v3 = vsel %vm4168_vm6, 0.0, %v2078_v55 }
 0x237   : > { %v4384_v63 = vpop.permute.xlu1 %2878  ;;  %2004 = vrot.lane.b32.xlu0 %v4382_v62, %s3868_s15  ;;  %v2239_v49 = vadd.f32 %v4317_v28, %v2079_v3  ;;  %v4505_v3 = vld [vmem:[%s6018_s5] ss:$0 sm:$0xff] }
 0x239   : > { %v4391_v1 = vpop.permute.xlu0 %1650  ;;  %1843 = vrot.lane.b32.xlu1 %v1782_v60, %s3866_s11 }
 0x23a   : > { %6082 = vst [vmem:[#allocation5_spill] sm:$0xff] %v4391_v1  ;;  %v1577_v1 = vsel %vm1487_vm4, 0.0, %v4111_v13  ;;  %v6033_v13 = vrot.slane %v4476_v31, 7 }
 0x23b   : > { %v4394_v2 = vpop.permute.xlu1 %2155  ;;  %2583 = vrot.lane.b32.xlu0 %v4382_v62, %s3870_s17 }
 0x23d   : > { %v4398_v4 = vpop.permute.xlu0 %1825  ;;  %2390 = vrot.lane.b32.xlu1 %v1782_v60, %s3869_s16 }
 0x23f   : > { %v4404_v8 = vpop.permute.xlu1 %2701  ;;  %1666 = vrot.lane.b32.xlu0 %v4401_v5, %s3864_s29 }
 0x241   : > { %v1985_v9 = vpop.permute.xlu0 %1984  ;;  %2894 = vrot.lane.b32.xlu1 %v1782_v60, %s3871_s18  ;;  %v1076_v60 = vand.u32 15, %v986_v41 }
 0x242   : > { %v2112_v20 = vadd.f32 %v1985_v9, %v1915_v53 }
 0x243   : > { %v4411_v17 = vpop.permute.xlu1 %1823  ;;  %1841 = vrot.lane.b32.xlu0 %v1780_v11, %s3866_s11  ;;  %vm4458_vm13 = vcmp.eq.s32.totalorder %v1076_v60, 15 }
 0x244   : > { %v2240_v28 = vadd.f32 %v4348_v44, %v2112_v20 }
 0x245   : > { %v4414_v18 = vpop.permute.xlu0 %1646  ;;  %2171 = vrot.lane.b32.xlu1 %v4401_v5, %s3865_s30 }
 0x247   : > { %v4421_v26 = vpop.permute.xlu1 %1986  ;;  %2000 = vrot.lane.b32.xlu0 %v4419_v24, %s3868_s15 }
 0x249   : > { %v2373_v33 = vpop.permute.xlu0 %2372  ;;  %2717 = vrot.lane.b32.xlu1 %v4401_v5, %s3867_s12 }
 0x24b   : > { %v2371_v39 = vpop.permute.xlu1 %2370  ;;  %2579 = vrot.lane.b32.xlu0 %v4419_v24, %s3870_s17  ;;  %v2315_v24 = vsel %vm4458_vm13, 0.0, %v1780_v11 }
 0x24c   : > { %v2466_v62 = vadd.f32 %v2371_v39, %v2239_v49  ;;  %v6090_v49 = vrot.slane %v4288_v14, 1 }
 0x24d   : > { %v4433_v46 = vpop.permute.xlu0 %2157  ;;  %1839 = vrot.lane.b32.xlu1 %v1778_v37, %s3866_s11 }
 0x24e   : > { %v1784_v53 = vsel %vm1759_vm3, %v6090_v49, %v6030_v43  ;;  %v4544_v49 = vpop.f32.mrf.mxu1 }
 0x24f   : > { %v2566_v56 = vpop.permute.xlu1 %2565  ;;  %1662 = vrot.lane.b32.xlu0 %v4436_v36, %s3864_s29 }
 0x250   : > { %v2661_v60 = vadd.f32 %v2566_v56, %v2466_v62  ;;  %v2467_v62 = vadd.f32 %v2373_v33, %v2240_v28  ;;  %v1090_v56 = vand.u32 15, %v988_v59  ;;  %v4528_v28 = vld [vmem:[%s6019_s6] ss:$0 sm:$0xff] }
 0x251   : > { %v4446_v21 = vpop.permute.xlu0 %2703  ;;  %2002 = vrot.lane.b32.xlu1 %v4442_v50, %s3868_s15 }
 0x252   : > { %v2786_v11 = vadd.f32 %v4306_v22, %v2661_v60  ;;  %v2662_v33 = vadd.f32 %v4376_v61, %v2467_v62  ;;  %vm4519_vm15 = vcmp.eq.s32.totalorder %v1090_v56, 15 }
 0x253   : > { %v4455_v41 = vpop.permute.xlu1 %2697  ;;  %2892 = vrot.lane.b32.xlu0 %v2825_v40, %s3871_s18 }
 0x254   : > { %v2971_v22 = vadd.f32 %v4384_v63, %v2786_v11  ;;  %v2787_v60 = vadd.f32 %v4324_v30, %v2662_v33  ;;  %v2317_v11 = vsel %vm4519_vm15, 0.0, %v1784_v53  ;;  %v6032_v33 = vrot.slane %v4436_v36, 7 }
 0x255   : > { %v4465_v55 = vpop.permute.xlu0 %1829  ;;  %2890 = vrot.lane.b32.xlu1 %v1778_v37, %s3871_s18 }
 0x256   : > { %v3010_v63 = vmul.f32 %v4505_v3, %v2971_v22 }
 0x257   : > { %v4470_v40 = vpop.permute.xlu1 %2151  ;;  %2388 = vrot.lane.b32.xlu0 %v2315_v24, %s3869_s16  ;;  %v2510_v24 = vsel %vm4479_vm14, 0.0, %v4442_v50 }
 0x258   : > { %v3049_v56 = vadd.f32 %v4528_v28, %v3010_v63  ;;  %v987_v63 = vadd.s32 80, %v4135_v23 }
 0x259   : > { %v4473_v57 = vpop.permute.xlu0 %2376  ;;  %2386 = vrot.lane.b32.xlu1 %v1778_v37, %s3869_s16 }
 0x25a   : > { %v3081_v50 = vmax.f32 %v3049_v56, 0.0 }
 0x25b   : > { %v4483_v39 = vpop.permute.xlu1 %1652  ;;  %2173 = vrot.lane.b32.xlu0 %v4476_v31, %s3865_s30 }
 0x25c   : > { %6089 = vst [vmem:[#allocation8_spill] sm:$0xff] %v4483_v39 }
 0x25d   : > { %v4492_v37 = vpop.permute.xlu0 %2699  ;;  %2581 = vrot.lane.b32.xlu1 %v2510_v24, %s3870_s17 }
 0x25f   : > { %v4496_v44 = vpop.permute.xlu1 %1990  ;;  %2719 = vrot.lane.b32.xlu0 %v4476_v31, %s3867_s12 }
 0x261   : > { %v4507_v6 = vpop.permute.xlu0 %2153  ;;  %2713 = vrot.lane.b32.xlu1 %v4436_v36, %s3867_s12 }
 0x263   : > { %v4516_v20 = vpop.permute.xlu1 %1648  ;;  %1845 = vrot.lane.b32.xlu0 %v1784_v53, %s3866_s11 }
 0x265   : > { %v2881_v59 = vpop.permute.xlu0 %2880  ;;  %2167 = vrot.lane.b32.xlu1 %v4436_v36, %s3865_s30 }
 0x266   : > { %v2972_v62 = vadd.f32 %v2881_v59, %v2787_v60 }
 0x267   : > { %v4534_v24 = vpop.permute.xlu1 %2569  ;;  %2392 = vrot.lane.b32.xlu0 %v2317_v11, %s3869_s16 }
 0x268   : > { %v3011_v30 = vmul.f32 %v4505_v3, %v2972_v62  ;;  %v6094_v62 = vrot.slane %v4288_v14, 7  ;;  %v1917_v14 = vsel %vm4188_vm7, 0.0, %v4398_v4 }
 0x269   : > { %v4540_v22 = vpop.permute.xlu0 %1996  ;;  %1668 = vrot.lane.b32.xlu1 %v4476_v31, %s3864_s29 }
 0x26a   : > { %v3050_v60 = vadd.f32 %v4528_v28, %v3011_v30  ;;  %v4557_v43 = vsel %vm1487_vm4, %v6094_v62, %v6032_v33  ;;  %v1578_v62 = vsel %vm4214_vm8, 0.0, %v1577_v1  ;;  %v6034_v33 = vrot.slane %v4476_v31, 1 }
 0x26b   : > { %v4547_v59 = vpop.permute.xlu1 %1835  ;;  %2715 = vrot.lane.b32.xlu0 %v4544_v49, %s3867_s12  ;;  %v2081_v1 = vsel %vm4214_vm8, 0.0, %v4421_v26 }
 0x26c   : > { %6093 = vst [vmem:[#allocation9_spill] sm:$0xff] %v4547_v59  ;;  %v3082_v11 = vmax.f32 %v3050_v60, 0.0  ;;  %v1083_v60 = vand.u32 15, %v987_v63  ;;  %v2827_v63 = vsel %vm4458_vm13, 0.0, %v1784_v53 }
 0x26d   : > { %v4559_v39 = vpop.permute.xlu0 %2575  ;;  %2006 = vrot.lane.b32.xlu1 %v4557_v43, %s3868_s15 }
 0x26e   : > { %v3113_v30 = vpack.c.bf16 %v3082_v11, %v3081_v50  ;;  %v1729_v50 = vadd.f32 %v4334_v38, %v4144_v27  ;;  %v6035_v11 = vrot.slane %v4401_v5, 7  ;;  %vm4588_vm0 = vcmp.eq.s32.totalorder %v1083_v60, 0 }
 0x26f   : > { %v4563_v59 = vpop.permute.xlu1 %2382  ;;  %2169 = vrot.lane.b32.xlu0 %v4544_v49, %s3865_s30  ;;  %v1787_v27 = vrot.slane %v4401_v5, 1  ;;  %v1728_v38 = vadd.f32 %v4285_v12, %v1578_v62 }
 0x270   : > { %3764 = vmatprep.mubr.msk.bf16.mxu1 %vm762_vm2, %v3113_v30  ;;  %v1948_v53 = vadd.f32 %v1917_v14, %v1729_v50  ;;  %v2512_v30 = vsel %vm4588_vm0, 0.0, %v4557_v43  ;;  %v4610_v12 = vsel %vm1487_vm4, %v6035_v11, %v6033_v13 }
 0x271   : > { %v4573_v56 = vpop.permute.xlu0 %1658  ;;  %1664 = vrot.lane.b32.xlu1 %v4544_v49, %s3864_s29  ;;  %v1947_v60 = vadd.f32 %v4411_v17, %v1728_v38  ;;  %v1790_v50 = vsel %vm1759_vm3, %v1787_v27, %v6034_v33 }
 0x272   : > { %v2114_v52 = vadd.f32 %v4356_v48, %v1948_v53  ;;  %v4630_v48 = vpop.f32.mrf.mxu1 }
 0x273   : > { %v4585_v42 = vpop.permute.xlu1 %2886  ;;  %2896 = vrot.lane.b32.xlu0 %v2827_v63, %s3871_s18  ;;  %v2113_v26 = vadd.f32 %v2081_v1, %v1947_v60 }
 0x275   : > { %v4601_v63 = vpop.permute.xlu0 %1833  ;;  %2585 = vrot.lane.b32.xlu1 %v2512_v30, %s3870_s17  ;;  %v2241_v38 = vadd.f32 %v4294_v16, %v2113_v26  ;;  %v2242_v30 = vadd.f32 %v4310_v25, %v2114_v52  ;;  %v1785_v25 = vrot.slane %v4544_v49, 1 }
 0x277   : > { %v4612_v14 = vpop.permute.xlu1 %2163  ;;  %2012 = vrot.lane.b32.xlu0 %v4610_v12, %s3868_s15  ;;  %v2469_v53 = vadd.f32 %v4473_v57, %v2242_v30  ;;  %v2468_v60 = vadd.f32 %v4364_v51, %v2241_v38 }
 0x279   : > { %v4620_v17 = vpop.permute.xlu0 %1992  ;;  %1851 = vrot.lane.b32.xlu1 %v1790_v50, %s3866_s11  ;;  %v2663_v16 = vadd.f32 %v4534_v24, %v2468_v60  ;;  %v1513_v24 = vrot.slane %v4544_v49, 7  ;;  %v6097_v60 = vrot.slane %v4436_v36, 1 }
 0x27b   : > { %v4623_v62 = vpop.permute.xlu1 %2709  ;;  %2591 = vrot.lane.b32.xlu0 %v4610_v12, %s3870_s17 }
 0x27d   : > { %v2572_v13 = vpop.permute.xlu0 %2571  ;;  %2398 = vrot.lane.b32.xlu1 %v1790_v50, %s3869_s16 }
 0x27e   : > { %v2664_v33 = vadd.f32 %v2572_v13, %v2469_v53  ;;  %v2788_v13 = vadd.f32 %v4455_v41, %v2663_v16  ;;  %v1580_v16 = vsel %vm4290_vm10, 0.0, %v4159_v32 }
 0x27f   : > { %v4633_v1 = vpop.permute.xlu1 %1831  ;;  %1674 = vrot.lane.b32.xlu0 %v4630_v48, %s3864_s29 }
 0x280   : > { %v2789_v57 = vadd.f32 %v4492_v37, %v2664_v33  ;;  %v1786_v37 = vsel %vm1759_vm3, %v6097_v60, %v1785_v25  ;;  %v989_v60 = vadd.s32 96, %v4135_v23 }
 0x281   : > { %v4638_v11 = vpop.permute.xlu0 %1654  ;;  %2902 = vrot.lane.b32.xlu1 %v1790_v50, %s3871_s18  ;;  %v1788_v50 = vsel %vm1759_vm3, %v1785_v25, %v1787_v27  ;;  %v6098_v27 = vrot.slane %v4436_v36, 7  ;;  %v1730_v25 = vadd.f32 %v4282_v58, %v1580_v16  ;;  %v2083_v36 = vsel %vm4290_vm10, 0.0, %v4496_v44 }
 0x282   : > { %v1919_v44 = vsel %vm4275_vm9, 0.0, %v4465_v55  ;;  %v1097_v16 = vand.u32 15, %v989_v60 }
 0x283   : > { %v4643_v52 = vpop.permute.xlu1 %1994  ;;  %2725 = vrot.lane.b32.xlu0 %v4630_v48, %s3867_s12  ;;  %v4664_v49 = vsel %vm1487_vm4, %v6098_v27, %v1513_v24  ;;  %v1949_v32 = vadd.f32 %v4352_v45, %v1730_v25  ;;  %v1731_v45 = vadd.f32 %v4330_v34, %v4121_v19 }
 0x284   : > { %vm4712_vm5 = vcmp.eq.s32.totalorder %v1097_v16, 0 }
 0x285   : > { %v2885_v26 = vpop.permute.xlu0 %2884  ;;  %2179 = vrot.lane.b32.xlu1 %v4630_v48, %s3865_s30  ;;  %v1950_v10 = vadd.f32 %v1919_v44, %v1731_v45 }
 0x286   : > { %v2974_v51 = vadd.f32 %v2885_v26, %v2789_v57 }
 0x287   : > { %v2883_v38 = vpop.permute.xlu1 %2882  ;;  %1849 = vrot.lane.b32.xlu0 %v1788_v50, %s3866_s11  ;;  %v2116_v19 = vadd.f32 %v4620_v17, %v1950_v10  ;;  %v6104_v10 = vrot.slane %v4476_v31, 1 }
 0x288   : > { %v3013_v30 = vmul.f32 %v4505_v3, %v2974_v51  ;;  %v2973_v53 = vadd.f32 %v2883_v38, %v2788_v13  ;;  %v6099_v13 = vrot.slane %v4401_v5, 7  ;;  %v990_v5 = vadd.s32 104, %v4135_v23 }
 0x289   : > { %v2381_v33 = vpop.permute.xlu0 %2380  ;;  %1847 = vrot.lane.b32.xlu1 %v1786_v37, %s3866_s11 }
 0x28a   : > { %v3052_v57 = vadd.f32 %v4528_v28, %v3013_v30  ;;  %v3012_v41 = vmul.f32 %v4505_v3, %v2973_v53  ;;  %v4676_v38 = vsel %vm1487_vm4, %v1513_v24, %v6099_v13  ;;  %v2115_v24 = vadd.f32 %v2083_v36, %v1949_v32 }
 0x28b   : > { %v2379_v26 = vpop.permute.xlu1 %2378  ;;  %2008 = vrot.lane.b32.xlu0 %v4664_v49, %s3868_s15  ;;  %v2829_v36 = vsel %vm4519_vm15, 0.0, %v1788_v50  ;;  %v2514_v17 = vsel %vm4712_vm5, 0.0, %v4676_v38 }
 0x28c   : > { %v3051_v51 = vadd.f32 %v4528_v28, %v3012_v41  ;;  %v3084_v53 = vmax.f32 %v3052_v57, 0.0  ;;  %v4698_v57 = vpop.f32.mrf.mxu1  ;;  %v2243_v55 = vadd.f32 %v4470_v40, %v2115_v24  ;;  %v992_v24 = vadd.s32 120, %v4135_v23 }
 0x28d   : > { %v4681_v30 = vpop.permute.xlu0 %2165  ;;  %2010 = vrot.lane.b32.xlu1 %v4676_v38, %s3868_s15 }
 0x28e   : > { %v3083_v58 = vmax.f32 %v3051_v51, 0.0  ;;  %v1104_v51 = vand.u32 15, %v990_v5  ;;  %v2470_v34 = vadd.f32 %v2379_v26, %v2243_v55  ;;  %v2244_v26 = vadd.f32 %v4507_v6, %v2116_v19  ;;  %v4741_v45 = vpop.f32.mrf.mxu1 }
 0x28f   : > { %v2574_v41 = vpop.permute.xlu1 %2573  ;;  %2587 = vrot.lane.b32.xlu0 %v4664_v49, %s3870_s17  ;;  %v6036_v6 = vrot.slane %v4698_v57, 1  ;;  %v6038_v29 = vrot.slane %v4741_v45, 7 }
 0x290   : > { %v3114_v15 = vpack.c.bf16 %v3084_v53, %v3083_v58  ;;  %vm4719_vm6 = vcmp.eq.s32.totalorder %v1104_v51, 15  ;;  %v2665_v58 = vadd.f32 %v2574_v41, %v2470_v34  ;;  %v2471_v41 = vadd.f32 %v2381_v33, %v2244_v26 }
 0x291   : > { %v4693_v27 = vpop.permute.xlu0 %2711  ;;  %2898 = vrot.lane.b32.xlu1 %v1786_v37, %s3871_s18  ;;  %v2319_v60 = vsel %vm4719_vm6, 0.0, %v1788_v50  ;;  %v1118_v50 = vand.u32 15, %v992_v24  ;;  %v1792_v55 = vsel %vm1759_vm3, %v6104_v10, %v6036_v6 }
 0x292   : > { %3765 = vmatmul.mubr.msk.bf16.vlgmr.msra.gmra.mxu1 %vm762_vm2, %v3114_v15  ;;  %v2790_v15 = vadd.f32 %v4404_v8, %v2665_v58  ;;  %v2666_v51 = vadd.f32 %v4559_v39, %v2471_v41  ;;  %v6037_v41 = vrot.slane %v4698_v57, 7 }
 0x293   : > { %v4701_v25 = vpop.permute.xlu1 %2705  ;;  %1670 = vrot.lane.b32.xlu0 %v4698_v57, %s3864_s29  ;;  %vm4762_vm7 = vcmp.eq.s32.totalorder %v1118_v50, 15  ;;  %v4783_v50 = vpop.f32.mrf.mxu1 }
 0x294   : > { %v2975_v33 = vadd.f32 %v4585_v42, %v2790_v15  ;;  %v2791_v42 = vadd.f32 %v4446_v21, %v2666_v51  ;;  %v991_v21 = vadd.s32 112, %v4135_v23 }
 0x295   : > { %v4706_v13 = vpop.permute.xlu0 %1837  ;;  %2394 = vrot.lane.b32.xlu1 %v1786_v37, %s3869_s16 }
 0x296   : > { %v3014_v39 = vmul.f32 %v4505_v3, %v2975_v33 }
 0x297   : > { %v4716_v53 = vpop.permute.xlu1 %2159  ;;  %2900 = vrot.lane.b32.xlu0 %v2829_v36, %s3871_s18 }
 0x299   : > { %v4726_v37 = vpop.permute.xlu0 %2384  ;;  %2589 = vrot.lane.b32.xlu1 %v2514_v17, %s3870_s17  ;;  %v2321_v17 = vsel %vm4762_vm7, 0.0, %v1792_v55 }
 0x29b   : > { %v4732_v5 = vpop.permute.xlu1 %1660  ;;  %2396 = vrot.lane.b32.xlu0 %v2319_v60, %s3869_s16  ;;  %v3053_v60 = vadd.f32 %v4528_v28, %v3014_v39  ;;  %v6107_v39 = vrot.slane %v4476_v31, 7  ;;  %v1921_v31 = vsel %vm4320_vm11, 0.0, %v4601_v63  ;;  %v1582_v63 = vsel %vm4367_vm12, 0.0, %v4203_v47 }
 0x29d   : > { %v4737_v44 = vpop.permute.xlu0 %2707  ;;  %2721 = vrot.lane.b32.xlu1 %v4698_v57, %s3867_s12 }
 0x29f   : > { %v4744_v16 = vpop.permute.xlu1 %1998  ;;  %2181 = vrot.lane.b32.xlu0 %v4741_v45, %s3865_s30 }
 0x2a1   : > { %v4750_v8 = vpop.permute.xlu0 %2161  ;;  %2175 = vrot.lane.b32.xlu1 %v4698_v57, %s3865_s30 }
 0x2a3   : > { %v4759_v19 = vpop.permute.xlu1 %1656  ;;  %1853 = vrot.lane.b32.xlu0 %v1792_v55, %s3866_s11 }
 0x2a5   : > { %v2889_v36 = vpop.permute.xlu0 %2888  ;;  %1676 = vrot.lane.b32.xlu1 %v4741_v45, %s3864_s29 }
 0x2a6   : > { %v2976_v58 = vadd.f32 %v2889_v36, %v2791_v42  ;;  %v4795_v42 = vsel %vm1487_vm4, %v6107_v39, %v6037_v41  ;;  %v3085_v36 = vmax.f32 %v3053_v60, 0.0  ;;  %v6040_v39 = vrot.slane %v4630_v48, 7 }
 0x2a7   : > { %v4772_v26 = vpop.permute.xlu1 %2577  ;;  %2400 = vrot.lane.b32.xlu0 %v2321_v17, %s3869_s16  ;;  %v1111_v17 = vand.u32 15, %v991_v21  ;;  %v1733_v21 = vadd.f32 %v4516_v20, %v4246_v0  ;;  %v1732_v0 = vadd.f32 %v4414_v18, %v1582_v63  ;;  %v2085_v41 = vsel %vm4367_vm12, 0.0, %v4643_v52 }
 0x2a8   : > { %v3015_v24 = vmul.f32 %v4505_v3, %v2976_v58  ;;  %v4847_v18 = vsel %vm1487_vm4, %v6040_v39, %v6038_v29  ;;  %v6111_v39 = vrot.slane %v4698_v57, 1 }
 0x2a9   : > { %v4778_v15 = vpop.permute.xlu0 %2004  ;;  %2727 = vrot.lane.b32.xlu1 %v4741_v45, %s3867_s12  ;;  %vm4813_vm8 = vcmp.eq.s32.totalorder %v1111_v17, 0  ;;  %v1952_v20 = vadd.f32 %v1921_v31, %v1733_v21  ;;  %6110 = vst [vmem:[#allocation10_spill] sm:$0xff] %v4847_v18 }
 0x2aa   : > { %v3054_v51 = vadd.f32 %v4528_v28, %v3015_v24  ;;  %v2516_v17 = vsel %vm4813_vm8, 0.0, %v4795_v42 }
 0x2ab   : > { %v4786_v33 = vpop.permute.xlu1 %1843  ;;  %2723 = vrot.lane.b32.xlu0 %v4783_v50, %s3867_s12  ;;  %v2118_v54 = vadd.f32 %v4540_v22, %v1952_v20 }
 0x2ac   : > { %v3086_v10 = vmax.f32 %v3054_v51, 0.0 }
 0x2ad   : > { %v4797_v58 = vpop.permute.xlu0 %2583  ;;  %2014 = vrot.lane.b32.xlu1 %v4795_v42, %s3868_s15 }
 0x2ae   : > { %v3115_v24 = vpack.c.bf16 %v3086_v10, %v3085_v36  ;;  %v2831_v10 = vsel %vm4719_vm6, 0.0, %v1792_v55  ;;  %v1795_v55 = vrot.slane %v4630_v48, 1 }
 0x2af   : > { %v4801_v6 = vpop.permute.xlu1 %2390  ;;  %2177 = vrot.lane.b32.xlu0 %v4783_v50, %s3865_s30 }
 0x2b0   : > { %3768 = vmatprep.mubr.msk.bf16.mxu1 %vm762_vm2, %v3115_v24  ;;  %v6039_v24 = vrot.slane %v4741_v45, 1 }
 0x2b1   : > { %v4809_v51 = vpop.permute.xlu0 %1666  ;;  %1672 = vrot.lane.b32.xlu1 %v4783_v50, %s3864_s29 }
 0x2b2   : > { %v1798_v21 = vsel %vm1759_vm3, %v1795_v55, %v6039_v24 }
 0x2b3   : > { %v4826_v36 = vpop.permute.xlu1 %2894  ;;  %2904 = vrot.lane.b32.xlu0 %v2831_v10, %s3871_s18  ;;  %v1951_v10 = vadd.f32 %v4633_v1, %v1732_v0  ;;  %v2246_v0 = vadd.f32 %v4433_v46, %v2118_v54  ;;  %v1793_v54 = vrot.slane %v4783_v50, 1 }
 0x2b5   : > { %v4838_v47 = vpop.permute.xlu0 %1841  ;;  %2593 = vrot.lane.b32.xlu1 %v2516_v17, %s3870_s17  ;;  %v2117_v52 = vadd.f32 %v2085_v41, %v1951_v10  ;;  %v4867_v41 = vpop.f32.mrf.mxu1  ;;  %v2473_v20 = vadd.f32 %v4726_v37, %v2246_v0  ;;  %v1796_v0 = vsel %vm1759_vm3, %v1793_v54, %v1795_v55  ;;  %v6112_v55 = vrot.slane %v4698_v57, 7 }
 0x2b6   : > { %v2087_v57 = vsel %vm4479_vm14, 0.0, %v4744_v16  ;;  %v1923_v16 = vsel %vm4458_vm13, 0.0, %v4706_v13  ;;  %v1925_v4 = vsel %vm4519_vm15, 0.0, %v4838_v47 }
 0x2b7   : > { %v4849_v31 = vpop.permute.xlu1 %2171  ;;  %2020 = vrot.lane.b32.xlu0 %v4847_v18, %s3868_s15  ;;  %v2245_v17 = vadd.f32 %v4394_v2, %v2117_v52 }
 0x2b9   : > { %1859 = vrot.lane.b32.xlu1 %v1798_v21, %s3866_s11  ;;  %v4858_v1 = vpop.permute.xlu0 %2000  ;;  %v2472_v29 = vadd.f32 %v4563_v59, %v2245_v17 }
 0x2bb   : > { %v4860_v63 = vpop.permute.xlu1 %2717  ;;  %2599 = vrot.lane.b32.xlu0 %v4847_v18, %s3870_s17  ;;  %v2667_v46 = vadd.f32 %v4772_v26, %v2472_v29  ;;  %v1521_v26 = vrot.slane %v4783_v50, 7 }
 0x2bd   : > { %2406 = vrot.lane.b32.xlu1 %v1798_v21, %s3869_s16  ;;  %v2580_v22 = vpop.permute.xlu0 %2579  ;;  %v4901_v50 = vsel %vm1487_vm4, %v6112_v55, %v1521_v26 }
 0x2be   : > { %v2668_v24 = vadd.f32 %v2580_v22, %v2473_v20  ;;  %6113 = vst [vmem:[#allocation11_spill] sm:$0xff] %v4901_v50 }
 0x2bf   : > { %v4870_v10 = vpop.permute.xlu1 %1839  ;;  %1682 = vrot.lane.b32.xlu0 %v4867_v41, %s3864_s29 }
 0x2c0   : > { %v2793_v37 = vadd.f32 %v4737_v44, %v2668_v24  ;;  %v1794_v44 = vsel %vm1759_vm3, %v6111_v39, %v1793_v54  ;;  %v6114_v39 = vld [vmem:[#allocation5_spill] sm:$0xff] }
 0x2c1   : > { %2910 = vrot.lane.b32.xlu1 %v1798_v21, %s3871_s18  ;;  %v4876_v2 = vpop.permute.xlu0 %1662  ;;  %v2792_v21 = vadd.f32 %v4701_v25, %v2667_v46  ;;  %v1584_v46 = vsel %vm4479_vm14, 0.0, %v4267_v7 }
 0x2c2   : > { %v1734_v54 = vadd.f32 %v6114_v39, %v1584_v46 }
 0x2c3   : > { %v4880_v52 = vpop.permute.xlu1 %2002  ;;  %2733 = vrot.lane.b32.xlu0 %v4867_v41, %s3867_s12 }
 0x2c5   : > { %2187 = vrot.lane.b32.xlu1 %v4867_v41, %s3865_s30  ;;  %v2893_v59 = vpop.permute.xlu0 %2892 }
 0x2c6   : > { %v2978_v17 = vadd.f32 %v2893_v59, %v2793_v37 }
 0x2c7   : > { %v2891_v29 = vpop.permute.xlu1 %2890  ;;  %1857 = vrot.lane.b32.xlu0 %v1796_v0, %s3866_s11 }
 0x2c8   : > { %v3017_v22 = vmul.f32 %v4505_v3, %v2978_v17  ;;  %v2977_v20 = vadd.f32 %v2891_v29, %v2792_v21  ;;  %v6115_v21 = vrot.slane %v4630_v48, 7  ;;  %v994_v48 = vadd.s32 136, %v4135_v23 }
 0x2c9   : > { %1855 = vrot.lane.b32.xlu1 %v1794_v44, %s3866_s11  ;;  %v2389_v24 = vpop.permute.xlu0 %2388 }
 0x2ca   : > { %v3056_v37 = vadd.f32 %v4528_v28, %v3017_v22  ;;  %v3016_v25 = vmul.f32 %v4505_v3, %v2977_v20  ;;  %v4913_v29 = vsel %vm1487_vm4, %v1521_v26, %v6115_v21  ;;  %v6117_v22 = vld [vmem:[#allocation9_spill] sm:$0xff] }
 0x2cb   : > { %v2387_v59 = vpop.permute.xlu1 %2386  ;;  %2016 = vrot.lane.b32.xlu0 %v4901_v50, %s3868_s15  ;;  %6116 = vst [vmem:[#allocation5_spill] sm:$0xff] %v4913_v29  ;;  %v1953_v20 = vadd.f32 %v6117_v22, %v1734_v54  ;;  %v6118_v54 = vld [vmem:[#allocation2_spill] sm:$0xff] }
 0x2cc   : > { %v3055_v17 = vadd.f32 %v4528_v28, %v3016_v25  ;;  %v3088_v55 = vmax.f32 %v3056_v37, 0.0  ;;  %v993_v25 = vadd.s32 128, %v4135_v23  ;;  %v4933_v37 = vpop.f32.mrf.mxu1 }
 0x2cd   : > { %2018 = vrot.lane.b32.xlu1 %v4913_v29, %s3868_s15  ;;  %v4920_v7 = vpop.permute.xlu0 %2173  ;;  %v2119_v26 = vadd.f32 %v2087_v57, %v1953_v20  ;;  %v1132_v57 = vand.u32 15, %v994_v48 }
 0x2ce   : > { %v3087_v46 = vmax.f32 %v3055_v17, 0.0  ;;  %v6119_v17 = vld [vmem:[#allocation8_spill] sm:$0xff]  ;;  %v1125_v18 = vand.u32 15, %v993_v25 }
 0x2cf   : > { %v2582_v39 = vpop.permute.xlu1 %2581  ;;  %2595 = vrot.lane.b32.xlu0 %v4901_v50, %s3870_s17  ;;  %v1735_v22 = vadd.f32 %v6119_v17, %v6118_v54  ;;  %v2247_v13 = vadd.f32 %v4716_v53, %v2119_v26  ;;  %vm4956_vm10 = vcmp.eq.s32.totalorder %v1132_v57, 15  ;;  %v4978_v57 = vpop.f32.mrf.mxu1 }
 0x2d0   : > { %v3116_v9 = vpack.c.bf16 %v3088_v55, %v3087_v46  ;;  %vm4949_vm9 = vcmp.eq.s32.totalorder %v1125_v18, 0  ;;  %v2323_v48 = vsel %vm4956_vm10, 0.0, %v1796_v0 }
 0x2d1   : > { %2906 = vrot.lane.b32.xlu1 %v1794_v44, %s3871_s18  ;;  %v4931_v21 = vpop.permute.xlu0 %2719  ;;  %v1954_v35 = vadd.f32 %v1923_v16, %v1735_v22  ;;  %v2474_v46 = vadd.f32 %v2387_v59, %v2247_v13  ;;  %v996_v16 = vadd.s32 152, %v4135_v23 }
 0x2d2   : > { %3769 = vmatmul.mubr.msk.bf16.gmra.mxu1 %vm762_vm2, %v3116_v9  ;;  %v2833_v9 = vsel %vm4762_vm7, 0.0, %v1796_v0 }
 0x2d3   : > { %v4938_v50 = vpop.permute.xlu1 %2713  ;;  %1678 = vrot.lane.b32.xlu0 %v4933_v37, %s3864_s29  ;;  %v2120_v55 = vadd.f32 %v4858_v1, %v1954_v35  ;;  %v2518_v1 = vsel %vm4949_vm9, 0.0, %v4913_v29  ;;  %v1146_v0 = vand.u32 15, %v996_v16 }
 0x2d5   : > { %2402 = vrot.lane.b32.xlu1 %v1794_v44, %s3869_s16  ;;  %v4944_v20 = vpop.permute.xlu0 %1845  ;;  %v2669_v44 = vadd.f32 %v2582_v39, %v2474_v46  ;;  %v2248_v18 = vadd.f32 %v4750_v8, %v2120_v55  ;;  %v6044_v8 = vrot.slane %v4933_v37, 1  ;;  %v995_v55 = vadd.s32 144, %v4135_v23 }
 0x2d6   : > { %v6124_v46 = vrot.slane %v4741_v45, 1  ;;  %vm5001_vm11 = vcmp.eq.s32.totalorder %v1146_v0, 15  ;;  %v6127_v0 = vrot.slane %v4741_v45, 7 }
 0x2d7   : > { %v4953_v54 = vpop.permute.xlu1 %2167  ;;  %2908 = vrot.lane.b32.xlu0 %v2833_v9, %s3871_s18  ;;  %v2475_v39 = vadd.f32 %v2389_v24, %v2248_v18  ;;  %v2794_v17 = vadd.f32 %v4623_v62, %v2669_v44  ;;  %v6043_v44 = vrot.slane %v4933_v37, 7  ;;  %v1139_v16 = vand.u32 15, %v995_v55 }
 0x2d8   : > { %v1800_v9 = vsel %vm1759_vm3, %v6124_v46, %v6044_v8  ;;  %v6131_v8 = vld [vmem:[#allocation3_spill] sm:$0xff] }
 0x2d9   : > { %2597 = vrot.lane.b32.xlu1 %v2518_v1, %s3870_s17  ;;  %v4964_v59 = vpop.permute.xlu0 %2392  ;;  %v2670_v13 = vadd.f32 %v4797_v58, %v2475_v39  ;;  %v2979_v24 = vadd.f32 %v4826_v36, %v2794_v17  ;;  %v2325_v17 = vsel %vm5001_vm11, 0.0, %v1800_v9  ;;  %vm5025_vm12 = vcmp.eq.s32.totalorder %v1139_v16, 0  ;;  %v5040_v16 = vpop.f32.mrf.mxu1 }
 0x2db   : > { %v4969_v26 = vpop.permute.xlu1 %1668  ;;  %2404 = vrot.lane.b32.xlu0 %v2323_v48, %s3869_s16  ;;  %v3018_v36 = vmul.f32 %v4505_v3, %v2979_v24  ;;  %v2795_v18 = vadd.f32 %v4693_v27, %v2670_v13  ;;  %v5017_v24 = vsel %vm1487_vm4, %v6127_v0, %v6043_v44 }
 0x2dc   : > { %6128 = vst [vmem:[#allocation9_spill] sm:$0xff] %v5017_v24  ;;  %v2520_v45 = vsel %vm5025_vm12, 0.0, %v5017_v24 }
 0x2dd   : > { %2729 = vrot.lane.b32.xlu1 %v4933_v37, %s3867_s12  ;;  %v4976_v22 = vpop.permute.xlu0 %2715  ;;  %v3057_v27 = vadd.f32 %v4528_v28, %v3018_v36 }
 0x2df   : > { %v4981_v35 = vpop.permute.xlu1 %2006  ;;  %2189 = vrot.lane.b32.xlu0 %v4978_v57, %s3865_s30 }
 0x2e1   : > { %2183 = vrot.lane.b32.xlu1 %v4933_v37, %s3865_s30  ;;  %v4989_v62 = vpop.permute.xlu0 %2169 }
 0x2e3   : > { %v4998_v1 = vpop.permute.xlu1 %1664  ;;  %1861 = vrot.lane.b32.xlu0 %v1800_v9, %s3866_s11 }
 0x2e5   : > { %1684 = vrot.lane.b32.xlu1 %v4978_v57, %s3864_s29  ;;  %v2897_v48 = vpop.permute.xlu0 %2896 }
 0x2e6   : > { %v2980_v39 = vadd.f32 %v2897_v48, %v2795_v18 }
 0x2e7   : > { %v2586_v46 = vpop.permute.xlu1 %2585  ;;  %2408 = vrot.lane.b32.xlu0 %v2325_v17, %s3869_s16 }
 0x2e8   : > { %v3019_v13 = vmul.f32 %v4505_v3, %v2980_v39  ;;  %v3089_v39 = vmax.f32 %v3057_v27, 0.0  ;;  %v1803_v27 = vrot.slane %v4867_v41, 1 }
 0x2e9   : > { %2735 = vrot.lane.b32.xlu1 %v4978_v57, %s3867_s12  ;;  %v5023_v55 = vpop.permute.xlu0 %2012 }
 0x2ea   : > { %v3058_v48 = vadd.f32 %v4528_v28, %v3019_v13  ;;  %v1586_v13 = vsel %vm4588_vm0, 0.0, %v6131_v8 }
 0x2eb   : > { %v5033_v17 = vpop.permute.xlu1 %1851  ;;  %2601 = vrot.lane.b32.xlu0 %v2520_v45, %s3870_s17  ;;  %v6047_v45 = vrot.slane %v4978_v57, 1 }
 0x2ec   : > { %v3090_v36 = vmax.f32 %v3058_v48, 0.0  ;;  %v1736_v48 = vadd.f32 %v4638_v11, %v1586_v13  ;;  %v6133_v13 = vld [vmem:[#allocation6_spill] sm:$0xff] }
 0x2ed   : > { %2022 = vrot.lane.b32.xlu1 %v5017_v24, %s3868_s15  ;;  %v5038_v0 = vpop.permute.xlu0 %2591 }
 0x2ee   : > { %v3117_v44 = vpack.c.bf16 %v3090_v36, %v3089_v39  ;;  %v2089_v36 = vsel %vm4588_vm0, 0.0, %v4880_v52  ;;  %v1955_v39 = vadd.f32 %v4870_v10, %v1736_v48  ;;  %v1737_v10 = vadd.f32 %v4759_v19, %v6133_v13 }
 0x2ef   : > { %v5045_v29 = vpop.permute.xlu1 %2398  ;;  %2731 = vrot.lane.b32.xlu0 %v5040_v16, %s3867_s12  ;;  %v2835_v48 = vsel %vm4956_vm10, 0.0, %v1800_v9 }
 0x2f0   : > { %3772 = vmatprep.mubr.msk.bf16.mxu1 %vm762_vm2, %v3117_v44  ;;  %v2121_v11 = vadd.f32 %v2089_v36, %v1955_v39  ;;  %v1806_v44 = vsel %vm1759_vm3, %v1803_v27, %v6047_v45  ;;  %v1531_v36 = vrot.slane %v4867_v41, 7  ;;  %v6048_v39 = vrot.slane %v4978_v57, 7 }
 0x2f1   : > { %1680 = vrot.lane.b32.xlu1 %v5040_v16, %s3864_s29  ;;  %v5058_v8 = vpop.permute.xlu0 %1674  ;;  %v1956_v61 = vadd.f32 %v1925_v4, %v1737_v10  ;;  %v5103_v10 = vpop.f32.mrf.mxu1 }
 0x2f2   : > { %6132 = vst [vmem:[#allocation2_spill] sm:$0xff] %v5058_v8  ;;  %v2249_v47 = vadd.f32 %v4612_v14, %v2121_v11  ;;  %v5090_v19 = vsel %vm1487_vm4, %v1531_v36, %v6048_v39  ;;  %v1801_v39 = vrot.slane %v5040_v16, 1 }
 0x2f3   : > { %v5061_v24 = vpop.permute.xlu1 %2902  ;;  %2185 = vrot.lane.b32.xlu0 %v5040_v16, %s3865_s30  ;;  %6135 = vst [vmem:[#allocation3_spill] sm:$0xff] %v5090_v19  ;;  %v2122_v41 = vadd.f32 %v4778_v15, %v1956_v61 }
 0x2f4   : > { %v2476_v4 = vadd.f32 %v4801_v6, %v2249_v47 }
 0x2f5   : > { %1867 = vrot.lane.b32.xlu1 %v1806_v44, %s3866_s11  ;;  %v5072_v52 = vpop.permute.xlu0 %2725 }
 0x2f6   : > { %v2671_v11 = vadd.f32 %v2586_v46, %v2476_v4  ;;  %v6136_v4 = vrot.slane %v4933_v37, 1 }
 0x2f7   : > { %v5080_v8 = vpop.permute.xlu1 %2179  ;;  %2912 = vrot.lane.b32.xlu0 %v2835_v48, %s3871_s18  ;;  %v2250_v48 = vadd.f32 %v4681_v30, %v2122_v41  ;;  %v1529_v41 = vrot.slane %v5040_v16, 7 }
 0x2f8   : > { %6134 = vst [vmem:[#allocation8_spill] sm:$0xff] %v5080_v8  ;;  %v1802_v30 = vsel %vm1759_vm3, %v6136_v4, %v1801_v39 }
 0x2f9   : > { %2414 = vrot.lane.b32.xlu1 %v1806_v44, %s3869_s16  ;;  %v5085_v45 = vpop.permute.xlu0 %1849  ;;  %v2477_v6 = vadd.f32 %v4964_v59, %v2250_v48  ;;  %v6137_v59 = vrot.slane %v4933_v37, 7 }
 0x2fa   : > { %v1929_v60 = vsel %vm4762_vm7, 0.0, %v5085_v45 }
 0x2fb   : > { %v5092_v9 = vpop.permute.xlu1 %1847  ;;  %2028 = vrot.lane.b32.xlu0 %v5090_v19, %s3868_s15 }
 0x2fd   : > { %2918 = vrot.lane.b32.xlu1 %v1806_v44, %s3871_s18  ;;  %v2009_v14 = vpop.permute.xlu0 %2008  ;;  %v2796_v44 = vadd.f32 %v4938_v50, %v2671_v11  ;;  %v5126_v11 = vsel %vm1487_vm4, %v6137_v59, %v1529_v41 }
 0x2fe   : > { %6138 = vst [vmem:[#allocation6_spill] sm:$0xff] %v5126_v11 }
 0x2ff   : > { %v5099_v13 = vpop.permute.xlu1 %2010  ;;  %2607 = vrot.lane.b32.xlu0 %v5090_v19, %s3870_s17 }
 0x301   : > { %2195 = vrot.lane.b32.xlu1 %v5103_v10, %s3865_s30  ;;  %v2588_v15 = vpop.permute.xlu0 %2587 }
 0x302   : > { %v2672_v61 = vadd.f32 %v2588_v15, %v2477_v6  ;;  %v1804_v6 = vsel %vm1759_vm3, %v1801_v39, %v1803_v27  ;;  %v2091_v27 = vsel %vm4712_vm5, 0.0, %v4981_v35 }
 0x303   : > { %v2899_v46 = vpop.permute.xlu1 %2898  ;;  %1690 = vrot.lane.b32.xlu0 %v5103_v10, %s3864_s29 }
 0x304   : > { %v2981_v47 = vadd.f32 %v2899_v46, %v2796_v44  ;;  %v2797_v48 = vadd.f32 %v4976_v22, %v2672_v61  ;;  %v6139_v44 = vld [vmem:[#allocation7_spill] sm:$0xff]  ;;  %v5140_v61 = vsel %vm1487_vm4, %v1529_v41, %v1531_v36  ;;  %v998_v36 = vadd.s32 168, %v4135_v23 }
 0x305   : > { %1863 = vrot.lane.b32.xlu1 %v1802_v30, %s3866_s11  ;;  %v5118_v19 = vpop.permute.xlu0 %1670  ;;  %v1588_v46 = vsel %vm4712_vm5, 0.0, %v6139_v44  ;;  %v6140_v44 = vld [vmem:[#allocation4_spill] sm:$0xff] }
 0x306   : > { %v3020_v50 = vmul.f32 %v4505_v3, %v2981_v47  ;;  %v1738_v37 = vadd.f32 %v4573_v56, %v1588_v46  ;;  %v997_v56 = vadd.s32 160, %v4135_v23  ;;  %v1739_v46 = vadd.f32 %v4732_v5, %v6140_v44 }
 0x307   : > { %v2395_v8 = vpop.permute.xlu1 %2394  ;;  %2741 = vrot.lane.b32.xlu0 %v5103_v10, %s3867_s12  ;;  %v2837_v5 = vsel %vm5001_vm11, 0.0, %v1804_v6 }
 0x308   : > { %v3059_v47 = vadd.f32 %v4528_v28, %v3020_v50  ;;  %v1957_v59 = vadd.f32 %v4786_v33, %v1738_v37 }
 0x309   : > { %2603 = vrot.lane.b32.xlu1 %v5126_v11, %s3870_s17  ;;  %v2901_v16 = vpop.permute.xlu0 %2900 }
 0x30a   : > { %v2982_v15 = vadd.f32 %v2901_v16, %v2797_v48  ;;  %v2123_v41 = vadd.f32 %v2091_v27, %v1957_v59  ;;  %v3091_v32 = vmax.f32 %v3059_v47, 0.0  ;;  %v1927_v16 = vsel %vm4719_vm6, 0.0, %v4944_v20 }
 0x30b   : > { %v2590_v4 = vpop.permute.xlu1 %2589  ;;  %1865 = vrot.lane.b32.xlu0 %v1804_v6, %s3866_s11  ;;  %v1160_v47 = vand.u32 15, %v998_v36  ;;  %v1958_v27 = vadd.f32 %v1927_v16, %v1739_v46  ;;  %v1000_v16 = vadd.s32 184, %v4135_v23 }
 0x30c   : > { %v3021_v22 = vmul.f32 %v4505_v3, %v2982_v15  ;;  %v5161_v15 = vpop.f32.mrf.mxu1  ;;  %v2251_v40 = vadd.f32 %v4953_v54, %v2123_v41 }
 0x30d   : > { %2026 = vrot.lane.b32.xlu1 %v5140_v61, %s3868_s15  ;;  %v2397_v39 = vpop.permute.xlu0 %2396  ;;  %v2124_v59 = vadd.f32 %v2009_v14, %v1958_v27  ;;  %vm5183_vm14 = vcmp.eq.s32.totalorder %v1160_v47, 15  ;;  %v999_v27 = vadd.s32 176, %v4135_v23 }
 0x30e   : > { %v3060_v48 = vadd.f32 %v4528_v28, %v3021_v22  ;;  %v1153_v22 = vand.u32 15, %v997_v56  ;;  %v2327_v41 = vsel %vm5183_vm14, 0.0, %v1804_v6  ;;  %v1174_v6 = vand.u32 15, %v1000_v16 }
 0x30f   : > { %v5150_v50 = vpop.permute.xlu1 %2721  ;;  %2024 = vrot.lane.b32.xlu0 %v5126_v11, %s3868_s15  ;;  %v2252_v36 = vadd.f32 %v4989_v62, %v2124_v59  ;;  %v1807_v62 = vrot.slane %v5161_v15, 1 }
 0x310   : > { %v3092_v35 = vmax.f32 %v3060_v48, 0.0  ;;  %v2478_v48 = vadd.f32 %v2395_v8, %v2251_v40  ;;  %vm5176_vm13 = vcmp.eq.s32.totalorder %v1153_v22, 0  ;;  %v6145_v40 = vrot.slane %v4978_v57, 1 }
 0x311   : > { %2914 = vrot.lane.b32.xlu1 %v1802_v30, %s3871_s18  ;;  %v5159_v33 = vpop.permute.xlu0 %2181  ;;  %v2522_v8 = vsel %vm5176_vm13, 0.0, %v5140_v61  ;;  %v2479_v44 = vadd.f32 %v2397_v39, %v2252_v36  ;;  %vm5228_vm15 = vcmp.eq.s32.totalorder %v1174_v6, 15  ;;  %v1167_v36 = vand.u32 15, %v999_v27 }
 0x312   : > { %v3118_v37 = vpack.c.bf16 %v3092_v35, %v3091_v32  ;;  %v1808_v59 = vsel %vm1759_vm3, %v6145_v40, %v1807_v62 }
 0x313   : > { %v5165_v11 = vpop.permute.xlu1 %2175  ;;  %1686 = vrot.lane.b32.xlu0 %v5161_v15, %s3864_s29  ;;  %v2329_v16 = vsel %vm5228_vm15, 0.0, %v1808_v59  ;;  %vm5252_vm0 = vcmp.eq.s32.totalorder %v1167_v36, 0 }
 0x314   : > { %3773 = vmatmul.mubr.msk.bf16.gmra.mxu1 %vm762_vm2, %v3118_v37  ;;  %v5205_v37 = vpop.f32.mrf.mxu1 }
 0x315   : > { %2410 = vrot.lane.b32.xlu1 %v1802_v30, %s3869_s16  ;;  %v5172_v20 = vpop.permute.xlu0 %1853  ;;  %v2673_v30 = vadd.f32 %v2590_v4, %v2478_v48  ;;  %v1535_v48 = vrot.slane %v5161_v15, 7 }
 0x316   : > { %v5267_v36 = vpop.f32.mrf.mxu1 }
 0x317   : > { %v5180_v32 = vpop.permute.xlu1 %1676  ;;  %2916 = vrot.lane.b32.xlu0 %v2837_v5, %s3871_s18  ;;  %v2798_v4 = vadd.f32 %v4860_v63, %v2673_v30  ;;  %v2674_v63 = vadd.f32 %v5038_v0, %v2479_v44  ;;  %v6148_v44 = vrot.slane %v4978_v57, 7 }
 0x319   : > { %2605 = vrot.lane.b32.xlu1 %v2522_v8, %s3870_s17  ;;  %v5191_v14 = vpop.permute.xlu0 %2400  ;;  %v2983_v47 = vadd.f32 %v5061_v24, %v2798_v4  ;;  %v2799_v30 = vadd.f32 %v4931_v21, %v2674_v63  ;;  %v5244_v6 = vsel %vm1487_vm4, %v6148_v44, %v1535_v48 }
 0x31a   : > { %6149 = vst [vmem:[#allocation7_spill] sm:$0xff] %v5244_v6  ;;  %v2524_v57 = vsel %vm5252_vm0, 0.0, %v5244_v6 }
 0x31b   : > { %v5196_v35 = vpop.permute.xlu1 %2727  ;;  %2412 = vrot.lane.b32.xlu0 %v2327_v41, %s3869_s16  ;;  %v3022_v0 = vmul.f32 %v4505_v3, %v2983_v47 }
 0x31d   : > { %2737 = vrot.lane.b32.xlu1 %v5161_v15, %s3867_s12  ;;  %v5203_v46 = vpop.permute.xlu0 %2723  ;;  %v3061_v21 = vadd.f32 %v4528_v28, %v3022_v0 }
 0x31f   : > { %v5208_v22 = vpop.permute.xlu1 %2014  ;;  %2197 = vrot.lane.b32.xlu0 %v5205_v37, %s3865_s30  ;;  %v3093_v0 = vmax.f32 %v3061_v21, 0.0  ;;  %v1811_v21 = vrot.slane %v5103_v10, 1 }
 0x321   : > { %2191 = vrot.lane.b32.xlu1 %v5161_v15, %s3865_s30  ;;  %v5216_v39 = vpop.permute.xlu0 %2177 }
 0x323   : > { %v5225_v5 = vpop.permute.xlu1 %1672  ;;  %1869 = vrot.lane.b32.xlu0 %v1808_v59, %s3866_s11 }
 0x325   : > { %1692 = vrot.lane.b32.xlu1 %v5205_v37, %s3864_s29  ;;  %v2905_v8 = vpop.permute.xlu0 %2904 }
 0x326   : > { %v2984_v41 = vadd.f32 %v2905_v8, %v2799_v30 }
 0x327   : > { %v2594_v4 = vpop.permute.xlu1 %2593  ;;  %2416 = vrot.lane.b32.xlu0 %v2329_v16, %s3869_s16 }
 0x328   : > { %v3023_v47 = vmul.f32 %v4505_v3, %v2984_v41 }
 0x329   : > { %2743 = vrot.lane.b32.xlu1 %v5205_v37, %s3867_s12  ;;  %v5250_v63 = vpop.permute.xlu0 %2020 }
 0x32a   : > { %v3062_v40 = vadd.f32 %v4528_v28, %v3023_v47  ;;  %v1590_v28 = vsel %vm4813_vm8, 0.0, %v4557_v43  ;;  %v6052_v47 = vrot.slane %v5205_v37, 1 }
 0x32b   : > { %v5260_v30 = vpop.permute.xlu1 %1859  ;;  %2609 = vrot.lane.b32.xlu0 %v2524_v57, %s3870_s17  ;;  %v1740_v44 = vadd.f32 %v4876_v2, %v1590_v28  ;;  %v1539_v28 = vrot.slane %v5103_v10, 7 }
 0x32c   : > { %v3094_v3 = vmax.f32 %v3062_v40, 0.0  ;;  %v2093_v40 = vsel %vm4813_vm8, 0.0, %v5099_v13 }
 0x32d   : > { %2030 = vrot.lane.b32.xlu1 %v5244_v6, %s3868_s15  ;;  %v5265_v8 = vpop.permute.xlu0 %2599  ;;  %v1959_v57 = vadd.f32 %v5092_v9, %v1740_v44  ;;  %v1741_v9 = vadd.f32 %v4998_v1, %v4664_v49  ;;  %v6051_v44 = vrot.slane %v5205_v37, 7 }
 0x32e   : > { %v3119_v41 = vpack.c.bf16 %v3094_v3, %v3093_v0  ;;  %v1814_v0 = vsel %vm1759_vm3, %v1811_v21, %v6052_v47 }
 0x32f   : > { %v5272_v16 = vpop.permute.xlu1 %2406  ;;  %2739 = vrot.lane.b32.xlu0 %v5267_v36, %s3867_s12  ;;  %v2125_v2 = vadd.f32 %v2093_v40, %v1959_v57  ;;  %v1960_v34 = vadd.f32 %v1929_v60, %v1741_v9  ;;  %v5317_v49 = vsel %vm1487_vm4, %v1539_v28, %v6051_v44  ;;  %v1809_v60 = vrot.slane %v5267_v36, 1 }
 0x330   : > { %3776 = vmatprep.mubr.msk.bf16.mxu1 %vm762_vm2, %v3119_v41  ;;  %v2839_v41 = vsel %vm5183_vm14, 0.0, %v1808_v59  ;;  %6154 = vst [vmem:[#allocation13_spill] sm:$0xff] %v5317_v49 }
 0x331   : > { %1688 = vrot.lane.b32.xlu1 %v5267_v36, %s3864_s29  ;;  %v5285_v43 = vpop.permute.xlu0 %1682  ;;  %v2253_v45 = vadd.f32 %v4849_v31, %v2125_v2  ;;  %v2126_v10 = vadd.f32 %v5023_v55, %v1960_v34 }
 0x332   : > { %6152 = vst [vmem:[#allocation4_spill] sm:$0xff] %v5285_v43 }
 0x333   : > { %v5288_v3 = vpop.permute.xlu1 %2910  ;;  %2193 = vrot.lane.b32.xlu0 %v5267_v36, %s3865_s30  ;;  %v2480_v59 = vadd.f32 %v5045_v29, %v2253_v45  ;;  %v2254_v44 = vadd.f32 %v4920_v7, %v2126_v10  ;;  %v1810_v7 = vsel %vm1759_vm3, %v1807_v62, %v1809_v60  ;;  %v5362_v62 = vld [vmem:[%s6018_s5] ss:$0 sm:$0xff] }
 0x335   : > { %1875 = vrot.lane.b32.xlu1 %v1814_v0, %s3866_s11  ;;  %v5299_v13 = vpop.permute.xlu0 %2733  ;;  %v2675_v2 = vadd.f32 %v2594_v4, %v2480_v59  ;;  %v2481_v29 = vadd.f32 %v5191_v14, %v2254_v44  ;;  %v1812_v4 = vsel %vm1759_vm3, %v1809_v60, %v1811_v21 }
 0x336   : > { %6153 = vst [vmem:[#allocation12_spill] sm:$0xff] %v5299_v13 }
 0x337   : > { %v5307_v40 = vpop.permute.xlu1 %2187  ;;  %2920 = vrot.lane.b32.xlu0 %v2839_v41, %s3871_s18  ;;  %v5333_v41 = vpop.f32.mrf.mxu1  ;;  %v2800_v55 = vadd.f32 %v5150_v50, %v2675_v2 }
 0x339   : > { %2422 = vrot.lane.b32.xlu1 %v1814_v0, %s3869_s16  ;;  %v5312_v57 = vpop.permute.xlu0 %1857 }
 0x33b   : > { %v5319_v1 = vpop.permute.xlu1 %1855  ;;  %2036 = vrot.lane.b32.xlu0 %v5317_v49, %s3868_s15 }
 0x33d   : > { %2926 = vrot.lane.b32.xlu1 %v1814_v0, %s3871_s18  ;;  %v5326_v31 = vpop.permute.xlu0 %2016  ;;  %v1537_v0 = vrot.slane %v5267_v36, 7  ;;  %v1002_v36 = vadd.s32 200, %v4135_v23 }
 0x33f   : > { %v5329_v9 = vpop.permute.xlu1 %2018  ;;  %2615 = vrot.lane.b32.xlu0 %v5317_v49, %s3870_s17  ;;  %v5352_v50 = vsel %vm1487_vm4, %v1535_v48, %v1537_v0  ;;  %v5368_v48 = vpop.f32.mrf.mxu1  ;;  %v1188_v60 = vand.u32 15, %v1002_v36  ;;  %v1001_v36 = vadd.s32 192, %v4135_v23 }
 0x340   : > { %6155 = vst [vmem:[#allocation14_spill] sm:$0xff] %v5352_v50  ;;  %v6173_v18 = vrot.slane %v5368_v48, 7 }
 0x341   : > { %v2596_v47 = vpop.permute.xlu0 %2595  ;;  %2203 = vrot.lane.b32.xlu1 %v5333_v41, %s3865_s30  ;;  %vm5400_vm5 = vcmp.eq.s32.totalorder %v1188_v60, 15  ;;  %v1181_v13 = vand.u32 15, %v1001_v36 }
 0x342   : > { %v2676_v45 = vadd.f32 %v2596_v47, %v2481_v29  ;;  %v5374_v29 = vpop.f32.mrf.mxu1 }
 0x343   : > { %v2907_v34 = vpop.permute.xlu1 %2906  ;;  %1873 = vrot.lane.b32.xlu0 %v1812_v4, %s3866_s11  ;;  %vm5442_vm6 = vcmp.eq.s32.totalorder %v1181_v13, 0  ;;  %v6187_v54 = vrot.slane %v5374_v29, 7 }
 0x344   : > { %v2985_v59 = vadd.f32 %v2907_v34, %v2800_v55  ;;  %v2801_v47 = vadd.f32 %v5203_v46, %v2676_v45  ;;  %v5379_v55 = vld [vmem:[%s6019_s6] ss:$0 sm:$0xff]  ;;  %v5384_v45 = vsel %vm1487_vm4, %v1537_v0, %v1539_v28  ;;  %v5404_v0 = vpop.f32.mrf.mxu1 }
 0x345   : > { %v5346_v10 = vpop.permute.xlu0 %1678  ;;  %1871 = vrot.lane.b32.xlu1 %v1810_v7, %s3866_s11  ;;  %6156 = vst [vmem:[#allocation15_spill] sm:$0xff] %v5384_v45 }
 0x346   : > { %v3024_v21 = vmul.f32 %v5362_v62, %v2985_v59 }
 0x347   : > { %v5354_v14 = vpop.permute.xlu1 %2402  ;;  %2032 = vrot.lane.b32.xlu0 %v5352_v50, %s3868_s15 }
 0x348   : > { %v3063_v46 = vadd.f32 %v5379_v55, %v3024_v21  ;;  %v1592_v21 = vsel %vm4949_vm9, 0.0, %v4676_v38  ;;  %v2095_v38 = vsel %vm4949_vm9, 0.0, %v5208_v22 }
 0x349   : > { %v2909_v15 = vpop.permute.xlu0 %2908  ;;  %2611 = vrot.lane.b32.xlu1 %v5352_v50, %s3870_s17  ;;  %v1742_v49 = vadd.f32 %v4809_v51, %v1592_v21  ;;  %v5410_v50 = vld [vmem:[%s6021_s8] ss:$0 sm:$0xff]  ;;  %v1931_v21 = vsel %vm4956_vm10, 0.0, %v5172_v20  ;;  %v3822_v20 = vld [vmem:[%s3955_s24 + $0x10] sm:$0xff] }
 0x34a   : > { %v2986_v44 = vadd.f32 %v2909_v15, %v2801_v47  ;;  %v2841_v15 = vsel %vm5228_vm15, 0.0, %v1812_v4  ;;  %v5422_v51 = vld [vmem:[%s6022_s9] ss:$0 sm:$0xff] }
 0x34b   : > { %v5370_v2 = vpop.permute.xlu1 %2597  ;;  %1694 = vrot.lane.b32.xlu0 %v5368_v48, %s3864_s29  ;;  %v1961_v60 = vadd.f32 %v5033_v17, %v1742_v49  ;;  %v1004_v17 = vadd.s32 216, %v4135_v23 }
 0x34c   : > { %v3025_v34 = vmul.f32 %v5362_v62, %v2986_v44 }
 0x34d   : > { %v5386_v59 = vpop.permute.xlu0 %2404  ;;  %2034 = vrot.lane.b32.xlu1 %v5384_v45, %s3868_s15  ;;  %v2127_v49 = vadd.f32 %v2095_v38, %v1961_v60  ;;  %v6159_v38 = vmov 0 }
 0x34e   : > { %v3064_v47 = vadd.f32 %v5379_v55, %v3025_v34  ;;  %v3095_v34 = vmax.f32 %v3063_v46, 0.0  ;;  %v2331_v46 = vsel %vm5400_vm5, 0.0, %v1812_v4  ;;  %v6160_v38 = vsel %vm5442_vm6, 4294967295, %v6159_v38 }
 0x34f   : > { %v5397_v44 = vpop.permute.xlu1 %2729  ;;  %2924 = vrot.lane.b32.xlu0 %v2841_v15, %s3871_s18  ;;  %6161 = vst [vmem:[#allocation16_spill] sm:$0xff] %v6160_v38  ;;  %v2255_v13 = vadd.f32 %v5165_v11, %v2127_v49  ;;  %v6060_v11 = vrot.slane %v5368_v48, 7 }
 0x350   : > { %v3096_v6 = vmax.f32 %v3064_v47, 0.0 }
 0x351   : > { %v5415_v15 = vpop.permute.xlu0 %2189  ;;  %2922 = vrot.lane.b32.xlu1 %v1810_v7, %s3871_s18 }
 0x352   : > { %v3766_v43 = vpop.f32.mrf.mxu1  ;;  %v3120_v47 = vpack.c.bf16 %v3096_v6, %v3095_v34  ;;  %v1743_v34 = vadd.f32 %v4969_v26, %v4610_v12  ;;  %v1202_v12 = vand.u32 15, %v1004_v17  ;;  %v3823_v17 = vld [vmem:[%s3955_s24] sm:$0xff] }
 0x353   : > { %v3351_v25 = vmul.f32 %v3766_v43, %v5410_v50  ;;  %v5427_v22 = vpop.permute.xlu1 %2183  ;;  %2420 = vrot.lane.b32.xlu0 %v2331_v46, %s3869_s16 }
 0x354   : > { %v3215_v36 = vpop.f32.mrf.mxu1  ;;  %3777 = vmatmul.mubr.msk.bf16.gmra.mxu1 %vm762_vm2, %v3120_v47  ;;  %v1962_v26 = vadd.f32 %v1931_v21, %v1743_v34  ;;  %v2482_v34 = vadd.f32 %v5354_v14, %v2255_v13  ;;  %vm5487_vm7 = vcmp.eq.s32.totalorder %v1202_v12, 15  ;;  %v3825_v13 = vld [vmem:[%s3955_s24 + $0x8] sm:$0xff] }
 0x355   : > { %v3390_v6 = vadd.f32 %v5422_v51, %v3351_v25  ;;  %v3349_v43 = vmul.f32 %v5410_v50, %v3215_v36  ;;  %v5437_v4 = vpop.permute.xlu0 %1861  ;;  %2418 = vrot.lane.b32.xlu1 %v1810_v7, %s3869_s16 }
 0x356   : > { %v3767_v60 = vpop.f32.mrf.mxu1  ;;  %v2128_v49 = vadd.f32 %v5326_v31, %v1962_v26  ;;  %v2677_v14 = vadd.f32 %v5370_v2, %v2482_v34 }
 0x357   : > { %v3422_v46 = vadd.f32 %v3822_v20, %v3390_v6  ;;  %v3388_v47 = vadd.f32 %v5422_v51, %v3349_v43  ;;  %v3352_v25 = vmul.f32 %v3767_v60, %v5410_v50  ;;  %v5450_v36 = vpop.permute.xlu1 %1684  ;;  %2205 = vrot.lane.b32.xlu0 %v5374_v29, %s3865_s30  ;;  %v2526_v6 = vsel %vm5442_vm6, 0.0, %v5384_v45 }
 0x358   : > { %6162 = vst [vmem:[#allocation17_spill] sm:$0xff] %v5450_v36  ;;  %v3218_v7 = vpop.f32.mrf.mxu1  ;;  %v1003_v43 = vadd.s32 208, %v4135_v23 }
 0x359   : > { %v3454_v60 = vmax.f32 %v3422_v46, 0.0  ;;  %v3420_v20 = vadd.f32 %v3823_v17, %v3388_v47  ;;  %v3391_v53 = vadd.f32 %v5422_v51, %v3352_v25  ;;  %v3350_v36 = vmul.f32 %v5410_v50, %v3218_v7  ;;  %v5469_v21 = vpop.permute.xlu0 %2408  ;;  %2613 = vrot.lane.b32.xlu1 %v2526_v6, %s3870_s17  ;;  %v3824_v17 = vld [vmem:[%s3955_s24 + $0x18] sm:$0xff] }
 0x35a   : > { %v6163_v46 = vrot.slane %v5368_v48, 1  ;;  %v6164_v47 = vrot.slane %v5205_v37, 1 }
 0x35b   : > { %3486 = vst.msk [vmem:[%s5459_s19 + $0x10] sm:$0xff] %vm425_vm1, %v3454_v60  ;;  %v3452_v7 = vmax.f32 %v3420_v20, 0.0  ;;  %v3423_v45 = vadd.f32 %v3824_v17, %v3391_v53  ;;  %v3389_v6 = vadd.f32 %v5422_v51, %v3350_v36  ;;  %v5484_v38 = vpop.permute.xlu1 %2735  ;;  %v1195_v53 = vand.u32 15, %v1003_v43 }
 0x35c   : > { %v1816_v25 = vsel %vm1759_vm3, %v6164_v47, %v6163_v46  ;;  %v2256_v36 = vadd.f32 %v5216_v39, %v2128_v49  ;;  %v2802_v43 = vadd.f32 %v5072_v52, %v2677_v14  ;;  %v1819_v14 = vrot.slane %v5333_v41, 1 }
 0x35d   : > { %1877 = vrot.lane.b32.xlu0 %v1816_v25, %s3866_s11  ;;  %3484 = vst.msk [vmem:[%s5459_s19] sm:$0xff] %vm425_vm1, %v3452_v7  ;;  %v3455_v26 = vmax.f32 %v3423_v45, 0.0  ;;  %v3421_v60 = vadd.f32 %v3825_v13, %v3389_v6  ;;  %v5495_v20 = vpop.permute.xlu0 %2601  ;;  %2745 = vrot.lane.b32.xlu1 %v5368_v48, %s3867_s12  ;;  %v2333_v12 = vsel %vm5487_vm7, 0.0, %v1816_v25  ;;  %v6167_v45 = vrot.slane %v5205_v37, 7 }
 0x35e   : > { %v2483_v39 = vadd.f32 %v5386_v59, %v2256_v36  ;;  %vm5522_vm8 = vcmp.eq.s32.totalorder %v1195_v53, 0  ;;  %v2987_v52 = vadd.f32 %v5288_v3, %v2802_v43  ;;  %v1978_v43 = vrot.slane %v5333_v41, 7 }
 0x35f   : > { %3487 = vst.msk [vmem:[%s5459_s19 + $0x18] sm:$0xff] %vm425_vm1, %v3455_v26  ;;  %v3453_v2 = vmax.f32 %v3421_v60, 0.0  ;;  %v5504_v34 = vpop.permute.xlu1 %2022  ;;  %v5512_v46 = vsel %vm1487_vm4, %v6167_v45, %v6060_v11  ;;  %v6059_v26 = vrot.slane %v5374_v29, 1  ;;  %v6171_v11 = vrot.slane %v5368_v48, 1 }
 0x360   : > { %6168 = vst [vmem:[#allocation18_spill] sm:$0xff] %v5512_v46  ;;  %v2528_v37 = vsel %vm5522_vm8, 0.0, %v5512_v46  ;;  %v2678_v59 = vadd.f32 %v5265_v8, %v2483_v39  ;;  %v3026_v13 = vmul.f32 %v5362_v62, %v2987_v52  ;;  %v2843_v52 = vsel %vm5400_vm5, 0.0, %v1816_v25 }
 0x361   : > { %2424 = vrot.lane.b32.xlu0 %v2333_v12, %s3869_s16  ;;  %3485 = vst.msk [vmem:[%s5459_s19 + $0x8] sm:$0xff] %vm425_vm1, %v3453_v2  ;;  %v5518_v49 = vpop.permute.xlu0 %2731  ;;  %2199 = vrot.lane.b32.xlu1 %v5368_v48, %s3865_s30  ;;  %v5557_v2 = vsel %vm1759_vm3, %v1819_v14, %v6059_v26  ;;  %v2097_v25 = vsel %vm5025_vm12, 0.0, %v5329_v9  ;;  %v1006_v48 = vadd.s32 232, %v4135_v23 }
 0x362   : > { %v2803_v3 = vadd.f32 %v5196_v35, %v2678_v59  ;;  %v3065_v36 = vadd.f32 %v5379_v55, %v3026_v13  ;;  %v1817_v35 = vrot.slane %v5404_v0, 1  ;;  %v1594_v59 = vsel %vm5025_vm12, 0.0, %v4795_v42 }
 0x363   : > { %v5529_v7 = vpop.permute.xlu1 %1680 }
 0x365   : > { %2617 = vrot.lane.b32.xlu0 %v2528_v37, %s3870_s17  ;;  %v5534_v17 = vpop.permute.xlu0 %2185  ;;  %2038 = vrot.lane.b32.xlu1 %v5512_v46, %s3868_s15 }
 0x367   : > { %v5538_v6 = vpop.permute.xlu1 %1867 }
 0x369   : > { %2747 = vrot.lane.b32.xlu0 %v5404_v0, %s3867_s12  ;;  %v2913_v60 = vpop.permute.xlu0 %2912  ;;  %1696 = vrot.lane.b32.xlu1 %v5404_v0, %s3864_s29 }
 0x36a   : > { %v2988_v8 = vadd.f32 %v2913_v60, %v2803_v3  ;;  %v1545_v3 = vrot.slane %v5404_v0, 7  ;;  %v1744_v60 = vadd.f32 %v5118_v19, %v1594_v59 }
 0x36b   : > { %v5548_v53 = vpop.permute.xlu1 %2414 }
 0x36c   : > { %v3027_v12 = vmul.f32 %v5362_v62, %v2988_v8  ;;  %v3097_v8 = vmax.f32 %v3065_v36, 0.0  ;;  %v1963_v42 = vadd.f32 %v5319_v1, %v1744_v60  ;;  %v5600_v9 = vsel %vm1487_vm4, %v6173_v18, %v1545_v3 }
 0x36d   : > { %2201 = vrot.lane.b32.xlu0 %v5404_v0, %s3865_s30  ;;  %v5560_v45 = vpop.permute.xlu0 %2028  ;;  %2430 = vrot.lane.b32.xlu1 %v5557_v2, %s3869_s16  ;;  %v6172_v0 = vrot.slane %v5374_v29, 7  ;;  %6174 = vst [vmem:[#allocation19_spill] sm:$0xff] %v5600_v9  ;;  %v1933_v1 = vsel %vm5001_vm11, 0.0, %v5312_v57  ;;  %v1820_v60 = vsel %vm1759_vm3, %v1817_v35, %v1819_v14  ;;  %v1979_v58 = vsel %vm1487_vm4, %v1545_v3, %v1978_v43 }
 0x36e   : > { %v3066_v37 = vadd.f32 %v5379_v55, %v3027_v12  ;;  %v1818_v12 = vsel %vm1759_vm3, %v6171_v11, %v1817_v35  ;;  %v2129_v11 = vadd.f32 %v2097_v25, %v1963_v42  ;;  %v6176_v42 = vld [vmem:[#allocation8_spill] sm:$0xff]  ;;  %v1005_v57 = vadd.s32 224, %v4135_v23  ;;  %v6177_v35 = vld [vmem:[#allocation9_spill] sm:$0xff] }
 0x36f   : > { %v5572_v13 = vpop.permute.xlu1 %2918  ;;  %v5590_v19 = vsel %vm1487_vm4, %v1978_v43, %v6172_v0  ;;  %v1216_v14 = vand.u32 15, %v1006_v48 }
 0x370   : > { %v3098_v26 = vmax.f32 %v3066_v37, 0.0  ;;  %v6175_v37 = vld [vmem:[#allocation11_spill] sm:$0xff] }
 0x371   : > { %2928 = vrot.lane.b32.xlu0 %v2843_v52, %s3871_s18  ;;  %v5583_v39 = vpop.permute.xlu0 %2607  ;;  %1879 = vrot.lane.b32.xlu1 %v1818_v12, %s3866_s11  ;;  %v1745_v59 = vadd.f32 %v5225_v5, %v6175_v37  ;;  %v1008_v5 = vadd.s32 248, %v4135_v23  ;;  %v6178_v37 = vld [vmem:[#allocation6_spill] sm:$0xff]  ;;  %vm5638_vm9 = vcmp.eq.s32.totalorder %v1216_v14, 15  ;;  %v6183_v14 = vrot.slane %v5374_v29, 1 }
 0x372   : > { %v3121_v52 = vpack.c.bf16 %v3098_v26, %v3097_v8  ;;  %v2335_v27 = vsel %vm5638_vm9, 0.0, %v1820_v60 }
 0x373   : > { %v5592_v36 = vpop.permute.xlu1 %2195  ;;  %v1964_v25 = vadd.f32 %v1933_v1, %v1745_v59  ;;  %v1598_v1 = vsel %vm5252_vm0, 0.0, %v6177_v35  ;;  %v1749_v59 = vadd.f32 %v5529_v7, %v6178_v37  ;;  %v2845_v35 = vsel %vm5487_vm7, 0.0, %v1820_v60 }
 0x374   : > { %3780 = vmatprep.mubr.msk.bf16.mxu1 %vm762_vm2, %v3121_v52  ;;  %v2257_v52 = vadd.f32 %v6176_v42, %v2129_v11  ;;  %v1748_v3 = vadd.f32 %v5346_v10, %v1598_v1  ;;  %v1209_v42 = vand.u32 15, %v1005_v57  ;;  %v1007_v7 = vadd.s32 240, %v4135_v23 }
 0x375   : > { %2044 = vrot.lane.b32.xlu0 %v5590_v19, %s3868_s15  ;;  %v5605_v26 = vpop.permute.xlu0 %1690  ;;  %2619 = vrot.lane.b32.xlu1 %v5600_v9, %s3870_s17  ;;  %v2130_v11 = vadd.f32 %v5250_v63, %v1964_v25  ;;  %v1230_v63 = vand.u32 15, %v1008_v5  ;;  %v5655_v1 = vsel %vm1759_vm3, %v6183_v14, 0.0 }
 0x376   : > { %v2484_v43 = vadd.f32 %v5272_v16, %v2257_v52  ;;  %vm5646_vm10 = vcmp.eq.s32.totalorder %v1209_v42, 0 }
 0x377   : > { %v1864_v8 = vpop.permute.xlu1 %1863  ;;  %vm5661_vm11 = vcmp.eq.s32.totalorder %v1230_v63, 15 }
 0x378   : > { %v1967_v25 = vadd.f32 %v1864_v8, %v1748_v3  ;;  %v1223_v3 = vand.u32 15, %v1007_v7 }
 0x379   : > { %1881 = vrot.lane.b32.xlu0 %v1820_v60, %s3866_s11  ;;  %v5617_v0 = vpop.permute.xlu0 %2741  ;;  %2042 = vrot.lane.b32.xlu1 %v1979_v58, %s3868_s15 }
 0x37a   : > { %vm5690_vm3 = vcmp.eq.s32.totalorder %v1223_v3, 0 }
 0x37b   : > { %v2604_v18 = vpop.permute.xlu1 %2603 }
 0x37d   : > { %2040 = vrot.lane.b32.xlu0 %v5600_v9, %s3868_s15  ;;  %v1866_v46 = vpop.permute.xlu0 %1865  ;;  %2930 = vrot.lane.b32.xlu1 %v1818_v12, %s3871_s18  ;;  %v2679_v9 = vadd.f32 %v5495_v20, %v2484_v43  ;;  %v2258_v20 = vadd.f32 %v5159_v33, %v2130_v11 }
 0x37e   : > { %v1937_v48 = vsel %vm5228_vm15, 0.0, %v1866_v46 }
 0x37f   : > { %v1968_v16 = vadd.f32 %v1937_v48, %v1749_v59  ;;  %v2027_v52 = vpop.permute.xlu1 %2026  ;;  %v2485_v23 = vadd.f32 %v5469_v21, %v2258_v20  ;;  %v2804_v33 = vadd.f32 %v5397_v44, %v2679_v9  ;;  %v6186_v44 = vld [vmem:[#allocation10_spill] sm:$0xff]  ;;  %v2530_v59 = vsel %vm5646_vm10, 0.0, %v1979_v58 }
 0x380   : > { %v2101_v24 = vsel %vm5252_vm0, 0.0, %v2027_v52  ;;  %v1747_v9 = vadd.f32 %v5180_v32, %v6186_v44  ;;  %v2337_v32 = vsel %vm5661_vm11, 0.0, %v5655_v1 }
 0x381   : > { %2932 = vrot.lane.b32.xlu0 %v2845_v35, %s3871_s18  ;;  %v2134_v8 = vadd.f32 %v5560_v45, %v1968_v16  ;;  %v2133_v57 = vadd.f32 %v2101_v24, %v1967_v25  ;;  %v2025_v5 = vpop.permute.xlu0 %2024  ;;  %2426 = vrot.lane.b32.xlu1 %v1818_v12, %s3869_s16  ;;  %v1935_v45 = vsel %vm5183_vm14, 0.0, %v5437_v4  ;;  %v2680_v60 = vadd.f32 %v2604_v18, %v2485_v23 }
 0x383   : > { %v2261_v12 = vadd.f32 %v5307_v40, %v2133_v57  ;;  %v2915_v43 = vpop.permute.xlu1 %2914  ;;  %v5671_v21 = vadd.f32 %v5415_v15, %v2134_v8  ;;  %v2501_v40 = vsel %vm1487_vm4, %v6187_v54, 0.0  ;;  %v1966_v15 = vadd.f32 %v1935_v45, %v1747_v9 }
 0x384   : > { %v2989_v37 = vadd.f32 %v2915_v43, %v2804_v33  ;;  %v2805_v63 = vadd.f32 %v5518_v49, %v2680_v60  ;;  %v6191_v33 = vld [vmem:[#allocation2_spill] sm:$0xff] }
 0x385   : > { %2428 = vrot.lane.b32.xlu0 %v2335_v27, %s3869_s16  ;;  %v5677_v42 = vpop.permute.xlu0 %1686  ;;  %2621 = vrot.lane.b32.xlu1 %v2530_v59, %s3870_s17  ;;  %v5684_v4 = vadd.f32 %v5548_v53, %v2261_v12  ;;  %v2132_v48 = vadd.f32 %v2025_v5, %v1966_v15  ;;  %v2532_v53 = vsel %vm5690_vm3, 0.0, %v2501_v40  ;;  %v6190_v5 = vld [vmem:[#allocation5_spill] sm:$0xff] }
 0x386   : > { %v3028_v35 = vmul.f32 %v5362_v62, %v2989_v37  ;;  %v1596_v14 = vsel %vm5176_vm13, 0.0, %v6190_v5 }
 0x387   : > { %v2411_v18 = vpop.permute.xlu1 %2410  ;;  %v2260_v24 = vadd.f32 %v5534_v17, %v2132_v48  ;;  %v1746_v27 = vadd.f32 %v6191_v33, %v1596_v14  ;;  %v1600_v33 = vsel %vm5442_vm6, 0.0, %v5140_v61 }
 0x388   : > { %v3067_v7 = vadd.f32 %v5379_v55, %v3028_v35 }
 0x389   : > { %2432 = vrot.lane.b32.xlu0 %v2337_v32, %s3869_s16  ;;  %v2917_v25 = vpop.permute.xlu0 %2916  ;;  %2625 = vrot.lane.b32.xlu1 %v2532_v53, %s3870_s17  ;;  %v1965_v3 = vadd.f32 %v5260_v30, %v1746_v27  ;;  %v2847_v30 = vsel %vm5638_vm9, 0.0, %v5655_v1 }
 0x38a   : > { %v2990_v16 = vadd.f32 %v2917_v25, %v2805_v63  ;;  %v3099_v45 = vmax.f32 %v3067_v7, 0.0  ;;  %v3827_v25 = vld [vmem:[%s3955_s24 + $0x20] sm:$0xff] }
 0x38b   : > { %v2606_v52 = vpop.permute.xlu1 %2605 }
 0x38c   : > { %v3029_v20 = vmul.f32 %v5362_v62, %v2990_v16 }
 0x38d   : > { %2623 = vrot.lane.b32.xlu0 %v5590_v19, %s3870_s17  ;;  %v2413_v8 = vpop.permute.xlu0 %2412  ;;  %2749 = vrot.lane.b32.xlu1 %v5333_v41, %s3867_s12  ;;  %v3872_v19 = vmov 0.0   ;;  %v2099_v41 = vsel %vm5176_vm13, 0.0, %v5504_v34 }
 0x38e   : > { %v3068_v49 = vadd.f32 %v5379_v55, %v3029_v20  ;;  %v2487_v57 = vadd.f32 %v2413_v8, %v2260_v24 }
 0x38f   : > { %v5710_v23 = vpop.permute.xlu1 %2737 }
 0x390   : > { %v3100_v17 = vmax.f32 %v3068_v49, 0.0  ;;  %v2682_v12 = vadd.f32 %v5583_v39, %v2487_v57  ;;  %v2131_v39 = vadd.f32 %v2099_v41, %v1965_v3  ;;  %v3828_v57 = vld [vmem:[%s3955_s24 + $0x38] sm:$0xff] }
 0x391   : > { %2627 = vrot.lane.b32.xlu0 %v3872_v19, %s3870_s17  ;;  %v5718_v43 = vpop.permute.xlu0 %2197  ;;  %2753 = vrot.lane.b32.xlu1 %v3872_v19, %s3867_s12 }
 0x392   : > { %v3122_v44 = vpack.c.bf16 %v3100_v17, %v3099_v45  ;;  %v3770_v9 = vpop.f32.mrf.mxu1  ;;  %v2807_v60 = vadd.f32 %v5484_v38, %v2682_v12  ;;  %v2259_v1 = vadd.f32 %v5427_v22, %v2131_v39  ;;  %v6193_v45 = vld [vmem:[#allocation4_spill] sm:$0xff]  ;;  %v3829_v12 = vld [vmem:[%s3955_s24 + $0x28] sm:$0xff] }
 0x393   : > { %v3355_v37 = vmul.f32 %v3770_v9, %v5410_v50  ;;  %v2192_v59 = vpop.permute.xlu1 %2191 }
 0x394   : > { %v3231_v56 = vpop.f32.mrf.mxu1  ;;  %3781 = vmatmul.mubr.msk.bf16.gmra.mxu1 %vm762_vm2, %v3122_v44  ;;  %v2486_v8 = vadd.f32 %v2411_v18, %v2259_v1  ;;  %v1750_v18 = vadd.f32 %v6193_v45, %v1600_v33 }
 0x395   : > { %2751 = vrot.lane.b32.xlu0 %v5374_v29, %s3867_s12  ;;  %v3394_v34 = vadd.f32 %v5422_v51, %v3355_v37  ;;  %v3353_v54 = vmul.f32 %v5410_v50, %v3231_v56  ;;  %v5732_v38 = vpop.permute.xlu0 %1869  ;;  %2936 = vrot.lane.b32.xlu1 %v2847_v30, %s3871_s18  ;;  %v3826_v29 = vld [vmem:[%s3955_s24 + $0x30] sm:$0xff] }
 0x396   : > { %v3771_v40 = vpop.f32.mrf.mxu1  ;;  %v2681_v27 = vadd.f32 %v2606_v52, %v2486_v8  ;;  %v1969_v44 = vadd.f32 %v5538_v6, %v1750_v18 }
 0x397   : > { %v3426_v15 = vadd.f32 %v3826_v29, %v3394_v34  ;;  %v3392_v32 = vadd.f32 %v5422_v51, %v3353_v54  ;;  %v3356_v48 = vmul.f32 %v3771_v40, %v5410_v50  ;;  %v5738_v35 = vpop.permute.xlu1 %1692  ;;  %v6195_v40 = vld [vmem:[#allocation15_spill] sm:$0xff] }
 0x398   : > { %v3234_v63 = vpop.f32.mrf.mxu1  ;;  %v1604_v6 = vsel %vm5646_vm10, 0.0, %v6195_v40 }
 0x399   : > { %2934 = vrot.lane.b32.xlu0 %v5557_v2, %s3871_s18  ;;  %v3458_v53 = vmax.f32 %v3426_v15, 0.0  ;;  %v3424_v16 = vadd.f32 %v3827_v25, %v3392_v32  ;;  %v3395_v7 = vadd.f32 %v5422_v51, %v3356_v48  ;;  %v3354_v20 = vmul.f32 %v5410_v50, %v3234_v63  ;;  %v2417_v24 = vpop.permute.xlu0 %2416 }
 0x39a   : > { %v1754_v15 = vadd.f32 %v5605_v26, %v1604_v6 }
 0x39b   : > { %3490 = vst.msk [vmem:[%s5459_s19 + $0x30] sm:$0xff] %vm425_vm1, %v3458_v53  ;;  %v3456_v49 = vmax.f32 %v3424_v16, 0.0  ;;  %v3427_v2 = vadd.f32 %v3828_v57, %v3395_v7  ;;  %v3393_v22 = vadd.f32 %v5422_v51, %v3354_v20  ;;  %v5750_v5 = vpop.permute.xlu1 %2743 }
 0x39d   : > { %2938 = vrot.lane.b32.xlu0 %v3872_v19, %s3871_s18  ;;  %3488 = vst.msk [vmem:[%s5459_s19 + $0x20] sm:$0xff] %vm425_vm1, %v3456_v49  ;;  %v3459_v17 = vmax.f32 %v3427_v2, 0.0  ;;  %v3425_v41 = vadd.f32 %v3829_v12, %v3393_v22  ;;  %v2610_v3 = vpop.permute.xlu0 %2609  ;;  %v6194_v19 = vld [vmem:[#allocation12_spill] sm:$0xff]  ;;  %v6196_v22 = vld [vmem:[#allocation14_spill] sm:$0xff]  ;;  %v2489_v12 = vadd.f32 %v2417_v24, %v5671_v21 }
 0x39e   : > { %v2806_v39 = vadd.f32 %v6194_v19, %v2681_v27  ;;  %v6198_v19 = vld [vmem:[#allocation17_spill] sm:$0xff]  ;;  %v2683_v28 = vadd.f32 %v2610_v3, %v5684_v4 }
 0x39f   : > { %3491 = vst.msk [vmem:[%s5459_s19 + $0x38] sm:$0xff] %vm425_vm1, %v3459_v17  ;;  %v3457_v9 = vmax.f32 %v3425_v41, 0.0  ;;  %v2031_v37 = vpop.permute.xlu1 %2030  ;;  %v1939_v41 = vsel %vm5400_vm5, 0.0, %v5732_v38 }
 0x3a0   : > { %v2103_v61 = vsel %vm5442_vm6, 0.0, %v2031_v37  ;;  %v2991_v54 = vadd.f32 %v5572_v13, %v2806_v39  ;;  %v6197_v37 = vld [vmem:[#allocation3_spill] sm:$0xff] }
 0x3a1   : > { %3489 = vst.msk [vmem:[%s5459_s19 + $0x28] sm:$0xff] %vm425_vm1, %v3457_v9  ;;  %v2135_v52 = vadd.f32 %v2103_v61, %v1969_v44  ;;  %v2740_v56 = vpop.permute.xlu0 %2739  ;;  %v1751_v39 = vadd.f32 %v6198_v19, %v6197_v37  ;;  %v6199_v61 = vld [vmem:[#allocation7_spill] sm:$0xff] }
 0x3a2   : > { %v3030_v48 = vmul.f32 %v5362_v62, %v2991_v54  ;;  %v1602_v31 = vsel %vm5522_vm8, 0.0, %v6199_v61 }
 0x3a3   : > { %v1689_v30 = vpop.permute.xlu1 %1688  ;;  %v5768_v34 = vadd.f32 %v2192_v59, %v2135_v52  ;;  %v1970_v21 = vadd.f32 %v1939_v41, %v1751_v39 }
 0x3a4   : > { %v3069_v59 = vadd.f32 %v5379_v55, %v3030_v48 }
 0x3a5   : > { %v2194_v29 = vpop.permute.xlu0 %2193 }
 0x3a6   : > { %v3101_v8 = vmax.f32 %v3069_v59, 0.0 }
 0x3a7   : > { %v1876_v32 = vpop.permute.xlu1 %1875 }
 0x3a8   : > { %v5776_v1 = vadd.f32 %v1876_v32, %v1754_v15 }
 0x3a9   : > { %v2921_v63 = vpop.permute.xlu0 %2920 }
 0x3aa   : > { %v2992_v53 = vadd.f32 %v2921_v63, %v2807_v60  ;;  %v1753_v60 = vadd.f32 %v1689_v30, %v6196_v22  ;;  %v1752_v30 = vadd.f32 %v5677_v42, %v1602_v31  ;;  %v2808_v63 = vadd.f32 %v5710_v23, %v2683_v28 }
 0x3ab   : > { %v2423_v25 = vpop.permute.xlu1 %2422 }
 0x3ac   : > { %v3031_v16 = vmul.f32 %v5362_v62, %v2992_v53 }
 0x3ad   : > { %v2037_v13 = vpop.permute.xlu0 %2036 }
 0x3ae   : > { %v3070_v7 = vadd.f32 %v5379_v55, %v3031_v16 }
 0x3af   : > { %v5781_v20 = vpop.permute.xlu1 %2926 }
 0x3b0   : > { %v3102_v49 = vmax.f32 %v3070_v7, 0.0 }
 0x3b1   : > { %v2616_v26 = vpop.permute.xlu0 %2615 }
 0x3b2   : > { %v3123_v57 = vpack.c.bf16 %v3102_v49, %v3101_v8 }
 0x3b3   : > { %v5783_v2 = vpop.permute.xlu1 %2203 }
 0x3b4   : > { %3784 = vmatprep.mubr.msk.bf16.mxu1 %vm762_vm2, %v3123_v57 }
 0x3b5   : > { %v1874_v14 = vpop.permute.xlu0 %1873 }
 0x3b6   : > { %v1941_v33 = vsel %vm5487_vm7, 0.0, %v1874_v14 }
 0x3b7   : > { %v1972_v27 = vadd.f32 %v1941_v33, %v1753_v60  ;;  %v1872_v45 = vpop.permute.xlu1 %1871 }
 0x3b8   : > { %v1971_v38 = vadd.f32 %v1872_v45, %v1752_v30 }
 0x3b9   : > { %v2138_v18 = vadd.f32 %v2037_v13, %v1972_v27  ;;  %v2033_v17 = vpop.permute.xlu0 %2032 }
 0x3ba   : > { %v2136_v40 = vadd.f32 %v2033_v17, %v1970_v21 }
 0x3bb   : > { %v2612_v44 = vpop.permute.xlu1 %2611  ;;  %v5794_v9 = vadd.f32 %v5718_v43, %v2138_v18 }
 0x3bc   : > { %v2684_v52 = vadd.f32 %v2612_v44, %v2489_v12  ;;  %v2264_v13 = vadd.f32 %v2194_v29, %v2136_v40 }
 0x3bd   : > { %v5802_v54 = vpop.permute.xlu0 %1694 }
 0x3be   : > { %v2809_v6 = vadd.f32 %v2740_v56, %v2684_v52 }
 0x3bf   : > { %v2035_v24 = vpop.permute.xlu1 %2034 }
 0x3c0   : > { %v2105_v43 = vsel %vm5522_vm8, 0.0, %v2035_v24  ;;  %v3831_v24 = vld [vmem:[%s3955_s24 + $0x40] sm:$0xff] }
 0x3c1   : > { %v2137_v15 = vadd.f32 %v2105_v43, %v1971_v38  ;;  %v2925_v32 = vpop.permute.xlu0 %2924 }
 0x3c2   : > { %v2994_v48 = vadd.f32 %v2925_v32, %v2809_v6 }
 0x3c3   : > { %v2265_v53 = vadd.f32 %v5592_v36, %v2137_v15  ;;  %v2923_v42 = vpop.permute.xlu1 %2922 }
 0x3c4   : > { %v3033_v59 = vmul.f32 %v5362_v62, %v2994_v48  ;;  %v2993_v16 = vadd.f32 %v2923_v42, %v2808_v63  ;;  %v3832_v48 = vld [vmem:[%s3955_s24 + $0x58] sm:$0xff] }
 0x3c5   : > { %v2421_v4 = vpop.permute.xlu0 %2420  ;;  %v5810_v3 = vadd.f32 %v2423_v25, %v2265_v53 }
 0x3c6   : > { %v3072_v7 = vadd.f32 %v5379_v55, %v3033_v59  ;;  %v3032_v47 = vmul.f32 %v5362_v62, %v2993_v16  ;;  %v2491_v56 = vadd.f32 %v2421_v4, %v2264_v13  ;;  %v3833_v16 = vld [vmem:[%s3955_s24 + $0x48] sm:$0xff] }
 0x3c7   : > { %v2419_v8 = vpop.permute.xlu1 %2418 }
 0x3c8   : > { %v3071_v49 = vadd.f32 %v5379_v55, %v3032_v47  ;;  %v2686_v57 = vadd.f32 %v2616_v26, %v2491_v56  ;;  %v3104_v36 = vmax.f32 %v3072_v7, 0.0  ;;  %v2490_v45 = vadd.f32 %v2419_v8, %v5768_v34  ;;  %v3830_v34 = vld [vmem:[%s3955_s24 + $0x50] sm:$0xff] }
 0x3c9   : > { %v5815_v23 = vpop.permute.xlu0 %2205 }
 0x3ca   : > { %v3103_v22 = vmax.f32 %v3071_v49, 0.0  ;;  %v2811_v60 = vadd.f32 %v5750_v5, %v2686_v57 }
 0x3cb   : > { %v2614_v14 = vpop.permute.xlu1 %2613 }
 0x3cc   : > { %v3124_v29 = vpack.c.bf16 %v3104_v36, %v3103_v22  ;;  %v2685_v26 = vadd.f32 %v2614_v14, %v2490_v45 }
 0x3ce   : > { %3785 = vmatmul.mubr.msk.bf16.gmra.mxu1 %vm762_vm2, %v3124_v29  ;;  %v2810_v39 = vadd.f32 %v5617_v0, %v2685_v26  ;;  %v6200_v29 = vld [vmem:[#allocation18_spill] sm:$0xff] }
 0x3cf   : > { %v5818_v33 = vpop.permute.xlu0 %1877  ;;  %v5821_v25 = vpop.permute.xlu1 %2745  ;;  %v1606_v45 = vsel %vm5690_vm3, 0.0, %v6200_v29 }
 0x3d0   : > { %v2995_v15 = vadd.f32 %v5781_v20, %v2810_v39 }
 0x3d2   : > { %v3034_v7 = vmul.f32 %v5362_v62, %v2995_v15 }
 0x3d3   : > { %v2425_v27 = vpop.permute.xlu0 %2424  ;;  %v5824_v18 = vpop.permute.xlu1 %2199 }
 0x3d4   : > { %v3774_v17 = vpop.f32.mrf.mxu1  ;;  %v3073_v49 = vadd.f32 %v5379_v55, %v3034_v7 }
 0x3d5   : > { %v3359_v12 = vmul.f32 %v3774_v17, %v5410_v50 }
 0x3d6   : > { %v3247_v41 = vpop.f32.mrf.mxu1  ;;  %v3105_v26 = vmax.f32 %v3073_v49, 0.0 }
 0x3d7   : > { %v2618_v5 = vpop.permute.xlu0 %2617  ;;  %v3398_v44 = vadd.f32 %v5422_v51, %v3359_v12  ;;  %v3357_v37 = vmul.f32 %v5410_v50, %v3247_v41  ;;  %v5829_v19 = vpop.permute.xlu1 %2038  ;;  %v1756_v12 = vadd.f32 %v5802_v54, %v1606_v45  ;;  %v2493_v41 = vadd.f32 %v2425_v27, %v5794_v9 }
 0x3d8   : > { %v3775_v61 = vpop.f32.mrf.mxu1 }
 0x3d9   : > { %v3430_v31 = vadd.f32 %v3830_v34, %v3398_v44  ;;  %v3396_v52 = vadd.f32 %v5422_v51, %v3357_v37  ;;  %v3360_v30 = vmul.f32 %v3775_v61, %v5410_v50  ;;  %v2687_v44 = vadd.f32 %v2618_v5, %v5810_v3 }
 0x3da   : > { %v3250_v28 = vpop.f32.mrf.mxu1 }
 0x3db   : > { %v2748_v21 = vpop.permute.xlu0 %2747  ;;  %v3462_v38 = vmax.f32 %v3430_v31, 0.0  ;;  %v3428_v40 = vadd.f32 %v3831_v24, %v3396_v52  ;;  %v3399_v43 = vadd.f32 %v5422_v51, %v3360_v30  ;;  %v3358_v0 = vmul.f32 %v5410_v50, %v3250_v28  ;;  %v1697_v6 = vpop.permute.xlu1 %1696 }
 0x3dc   : > { %v2812_v28 = vadd.f32 %v5821_v25, %v2687_v44  ;;  %v1943_v25 = vsel %vm5638_vm9, 0.0, %v5818_v33 }
 0x3dd   : > { %3494 = vst.msk [vmem:[%s5459_s19 + $0x50] sm:$0xff] %vm425_vm1, %v3462_v38  ;;  %v3460_v32 = vmax.f32 %v3428_v40, 0.0  ;;  %v3431_v63 = vadd.f32 %v3832_v48, %v3399_v43  ;;  %v3397_v53 = vadd.f32 %v5422_v51, %v3358_v0 }
 0x3df   : > { %v5843_v42 = vpop.permute.xlu0 %2201  ;;  %3492 = vst.msk [vmem:[%s5459_s19 + $0x40] sm:$0xff] %vm425_vm1, %v3460_v32  ;;  %v3463_v59 = vmax.f32 %v3431_v63, 0.0  ;;  %v3429_v13 = vadd.f32 %v3833_v16, %v3397_v53  ;;  %v5848_v4 = vpop.permute.xlu1 %2430  ;;  %v6201_v32 = vld [vmem:[#allocation13_spill] sm:$0xff] }
 0x3e1   : > { %3495 = vst.msk [vmem:[%s5459_s19 + $0x58] sm:$0xff] %vm425_vm1, %v3463_v59  ;;  %v3461_v20 = vmax.f32 %v3429_v13, 0.0  ;;  %v6202_v13 = vld [vmem:[#allocation19_spill] sm:$0xff] }
 0x3e2   : > { %v1757_v7 = vadd.f32 %v1697_v6, %v6202_v13  ;;  %v3835_v13 = vld [vmem:[%s3955_s24 + $0x60] sm:$0xff] }
 0x3e3   : > { %v2929_v47 = vpop.permute.xlu0 %2928  ;;  %3493 = vst.msk [vmem:[%s5459_s19 + $0x48] sm:$0xff] %vm425_vm1, %v3461_v20  ;;  %v1880_v8 = vpop.permute.xlu1 %1879 }
 0x3e4   : > { %v2996_v56 = vadd.f32 %v2929_v47, %v2811_v60  ;;  %v1975_v39 = vadd.f32 %v1880_v8, %v1756_v12  ;;  %v2107_v47 = vsel %vm5646_vm10, 0.0, %v5829_v19 }
 0x3e5   : > { %v2139_v8 = vadd.f32 %v2107_v47, %v5776_v1 }
 0x3e6   : > { %v3035_v57 = vmul.f32 %v5362_v62, %v2996_v56 }
 0x3e7   : > { %v2045_v36 = vpop.permute.xlu0 %2044  ;;  %v2620_v14 = vpop.permute.xlu1 %2619  ;;  %v2267_v6 = vadd.f32 %v5824_v18, %v2139_v8 }
 0x3e8   : > { %v3074_v22 = vadd.f32 %v5379_v55, %v3035_v57  ;;  %v2688_v34 = vadd.f32 %v2620_v14, %v2493_v41 }
 0x3ea   : > { %v3106_v17 = vmax.f32 %v3074_v22, 0.0  ;;  %v2813_v9 = vadd.f32 %v2748_v21, %v2688_v34  ;;  %v1755_v21 = vadd.f32 %v5738_v35, %v6201_v32 }
 0x3eb   : > { %v1882_v60 = vpop.permute.xlu0 %1881  ;;  %v2043_v61 = vpop.permute.xlu1 %2042 }
 0x3ec   : > { %v3125_v37 = vpack.c.bf16 %v3106_v17, %v3105_v26  ;;  %v2109_v31 = vsel %vm5690_vm3, 0.0, %v2043_v61  ;;  %v1945_v53 = vsel %vm5661_vm11, 0.0, %v1882_v60  ;;  %v1974_v16 = vadd.f32 %v1943_v25, %v1755_v21 }
 0x3ed   : > { %v2141_v52 = vadd.f32 %v2109_v31, %v1975_v39  ;;  %v1976_v33 = vadd.f32 %v1945_v53, %v1757_v7 }
 0x3ee   : > { %3788 = vmatprep.mubr.msk.bf16.mxu1 %vm762_vm2, %v3125_v37 }
 0x3ef   : > { %v2041_v30 = vpop.permute.xlu0 %2040  ;;  %v2269_v54 = vadd.f32 %v5783_v2, %v2141_v52  ;;  %v2931_v38 = vpop.permute.xlu1 %2930  ;;  %v2142_v11 = vadd.f32 %v2045_v36, %v1976_v33  ;;  %v3836_v33 = vld [vmem:[%s3955_s24 + $0x78] sm:$0xff] }
 0x3f0   : > { %v2997_v24 = vadd.f32 %v2931_v38, %v2812_v28  ;;  %v2140_v56 = vadd.f32 %v2041_v30, %v1974_v16 }
 0x3f1   : > { %v2270_v46 = vadd.f32 %v5815_v23, %v2142_v11  ;;  %v2496_v1 = vadd.f32 %v5848_v4, %v2269_v54 }
 0x3f2   : > { %v3036_v3 = vmul.f32 %v5362_v62, %v2997_v24  ;;  %v2268_v57 = vadd.f32 %v5843_v42, %v2140_v56 }
 0x3f3   : > { %v2933_v27 = vpop.permute.xlu0 %2932  ;;  %v2427_v40 = vpop.permute.xlu1 %2426 }
 0x3f4   : > { %v2998_v5 = vadd.f32 %v2933_v27, %v2813_v9  ;;  %v3075_v43 = vadd.f32 %v5379_v55, %v3036_v3  ;;  %v2494_v45 = vadd.f32 %v2427_v40, %v2267_v6 }
 0x3f6   : > { %v3037_v58 = vmul.f32 %v5362_v62, %v2998_v5  ;;  %v3107_v48 = vmax.f32 %v3075_v43, 0.0 }
 0x3f7   : > { %v2429_v0 = vpop.permute.xlu0 %2428  ;;  %v2622_v2 = vpop.permute.xlu1 %2621 }
 0x3f8   : > { %v3076_v15 = vadd.f32 %v5379_v55, %v3037_v58  ;;  %v2495_v14 = vadd.f32 %v2429_v0, %v2268_v57  ;;  %v2689_v17 = vadd.f32 %v2622_v2, %v2494_v45 }
 0x3fa   : > { %v3108_v63 = vmax.f32 %v3076_v15, 0.0 }
 0x3fb   : > { %v2433_v59 = vpop.permute.xlu0 %2432  ;;  %v2626_v10 = vpop.permute.xlu1 %2625 }
 0x3fc   : > { %v3126_v20 = vpack.c.bf16 %v3108_v63, %v3107_v48  ;;  %v2497_v12 = vadd.f32 %v2433_v59, %v2270_v46  ;;  %v2691_v39 = vadd.f32 %v2626_v10, %v2496_v1  ;;  %v3839_v1 = vld [vmem:[%s3955_s24 + $0x80] sm:$0xff] }
 0x3fe   : > { %3789 = vmatmul.mubr.msk.bf16.gmra.mxu1 %vm762_vm2, %v3126_v20 }
 0x3ff   : > { %v2624_v35 = vpop.permute.xlu0 %2623  ;;  %v2750_v49 = vpop.permute.xlu1 %2749 }
 0x400   : > { %v2690_v19 = vadd.f32 %v2624_v35, %v2495_v14  ;;  %v2814_v44 = vadd.f32 %v2750_v49, %v2689_v17  ;;  %v3837_v49 = vld [vmem:[%s3955_s24 + $0x68] sm:$0xff] }
 0x403   : > { %v2628_v22 = vpop.permute.xlu0 %2627  ;;  %v2754_v29 = vpop.permute.xlu1 %2753 }
 0x404   : > { %v2692_v36 = vadd.f32 %v2628_v22, %v2497_v12  ;;  %v2816_v34 = vadd.f32 %v2754_v29, %v2691_v39  ;;  %v3840_v39 = vld [vmem:[%s3955_s24 + $0x98] sm:$0xff] }
 0x406   : > { %v2817_v31 = vadd.f32 %v2754_v29, %v2692_v36 }
 0x407   : > { %v2752_v26 = vpop.permute.xlu0 %2751  ;;  %v2937_v41 = vpop.permute.xlu1 %2936 }
 0x408   : > { %v2815_v60 = vadd.f32 %v2752_v26, %v2690_v19  ;;  %v3838_v19 = vld [vmem:[%s3955_s24 + $0x90] sm:$0xff] }
 0x40a   : > { %v3000_v37 = vadd.f32 %v2937_v41, %v2815_v60 }
 0x40b   : > { %v2935_v42 = vpop.permute.xlu0 %2934 }
 0x40c   : > { %v3039_v18 = vmul.f32 %v5362_v62, %v3000_v37  ;;  %v2999_v61 = vadd.f32 %v2935_v42, %v2814_v44 }
 0x40e   : > { %v3078_v23 = vadd.f32 %v5379_v55, %v3039_v18  ;;  %v3038_v52 = vmul.f32 %v5362_v62, %v2999_v61 }
 0x40f   : > { %v2939_v30 = vpop.permute.xlu0 %2938 }
 0x410   : > { %v3077_v28 = vadd.f32 %v5379_v55, %v3038_v52  ;;  %v3001_v38 = vadd.f32 %v2939_v30, %v2816_v34  ;;  %v3002_v24 = vadd.f32 %v2939_v30, %v2817_v31  ;;  %v3110_v4 = vmax.f32 %v3078_v23, 0.0  ;;  %v3841_v31 = vld [vmem:[%s3955_s24 + $0x88] sm:$0xff]  ;;  %v5943_v30 = vld [vmem:[%s6021_s8] ss:$0 sm:$0xff] }
 0x412   : > { %v3109_v54 = vmax.f32 %v3077_v28, 0.0  ;;  %v3040_v9 = vmul.f32 %v5362_v62, %v3001_v38  ;;  %v3041_v27 = vmul.f32 %v5362_v62, %v3002_v24  ;;  %v5949_v38 = vld [vmem:[%s6022_s9] ss:$0 sm:$0xff] }
 0x414   : > { %v3127_v3 = vpack.c.bf16 %v3110_v4, %v3109_v54  ;;  %v3079_v5 = vadd.f32 %v5379_v55, %v3040_v9  ;;  %v3080_v40 = vadd.f32 %v5379_v55, %v3041_v27  ;;  %v3778_v0 = vpop.f32.mrf.mxu1  ;;  %v3834_v55 = vld [vmem:[%s3955_s24 + $0x70] sm:$0xff] }
 0x415   : > { %v3363_v15 = vmul.f32 %v3778_v0, %v5410_v50  ;;  %v3844_v9 = vld [vmem:[%s3955_s24 + $0xb0] sm:$0xff] }
 0x416   : > { %v3111_v43 = vmax.f32 %v3079_v5, 0.0  ;;  %v3112_v58 = vmax.f32 %v3080_v40, 0.0  ;;  %3792 = vmatprep.mubr.msk.bf16.mxu1 %vm762_vm2, %v3127_v3  ;;  %v3263_v2 = vpop.f32.mrf.mxu1 }
 0x417   : > { %v3402_v32 = vadd.f32 %v5422_v51, %v3363_v15  ;;  %v3361_v62 = vmul.f32 %v5410_v50, %v3263_v2 }
 0x418   : > { %v3128_v25 = vpack.c.bf16 %v3112_v58, %v3111_v43  ;;  %v3779_v21 = vpop.f32.mrf.mxu1  ;;  %v3845_v58 = vld [vmem:[%s3955_s24 + $0xa0] sm:$0xff] }
 0x419   : > { %v3434_v48 = vadd.f32 %v3834_v55, %v3402_v32  ;;  %v3400_v63 = vadd.f32 %v5422_v51, %v3361_v62  ;;  %v3364_v53 = vmul.f32 %v3779_v21, %v5410_v50  ;;  %v3846_v32 = vld [vmem:[%s3955_s24 + $0xb8] sm:$0xff] }
 0x41a   : > { %3793 = vmatmul.mubr.msk.bf16.gmra.mxu1 %vm762_vm2, %v3128_v25  ;;  %v3266_v59 = vpop.f32.mrf.mxu1 }
 0x41b   : > { %v3466_v16 = vmax.f32 %v3434_v48, 0.0  ;;  %v3432_v7 = vadd.f32 %v3835_v13, %v3400_v63  ;;  %v3403_v20 = vadd.f32 %v5422_v51, %v3364_v53  ;;  %v3362_v47 = vmul.f32 %v5410_v50, %v3266_v59  ;;  %v3847_v48 = vld [vmem:[%s3955_s24 + $0xa8] sm:$0xff] }
 0x41d   : > { %3498 = vst.msk [vmem:[%s5459_s19 + $0x70] sm:$0xff] %vm425_vm1, %v3466_v16  ;;  %v3464_v10 = vmax.f32 %v3432_v7, 0.0  ;;  %v3435_v56 = vadd.f32 %v3836_v33, %v3403_v20  ;;  %v3401_v35 = vadd.f32 %v5422_v51, %v3362_v47 }
 0x41f   : > { %3496 = vst.msk [vmem:[%s5459_s19 + $0x60] sm:$0xff] %vm425_vm1, %v3464_v10  ;;  %v3467_v8 = vmax.f32 %v3435_v56, 0.0  ;;  %v3433_v11 = vadd.f32 %v3837_v49, %v3401_v35  ;;  %v3848_v10 = vld [vmem:[%s3955_s24 + $0xd0] sm:$0xff] }
 0x421   : > { %3499 = vst.msk [vmem:[%s5459_s19 + $0x78] sm:$0xff] %vm425_vm1, %v3467_v8  ;;  %v3465_v57 = vmax.f32 %v3433_v11, 0.0  ;;  %v3849_v11 = vld [vmem:[%s3955_s24 + $0xc0] sm:$0xff] }
 0x423   : > { %3497 = vst.msk [vmem:[%s5459_s19 + $0x68] sm:$0xff] %vm425_vm1, %v3465_v57 }
 0x454   : > { %v3782_v22 = vpop.f32.mrf.mxu1 }
 0x455   : > { %v3367_v6 = vmul.f32 %v3782_v22, %v5410_v50 }
 0x456   : > { %v3279_v14 = vpop.f32.mrf.mxu1 }
 0x457   : > { %v3406_v29 = vadd.f32 %v5422_v51, %v3367_v6  ;;  %v3365_v45 = vmul.f32 %v5410_v50, %v3279_v14 }
 0x458   : > { %v3783_v46 = vpop.f32.mrf.mxu1 }
 0x459   : > { %v3438_v26 = vadd.f32 %v3838_v19, %v3406_v29  ;;  %v3404_v17 = vadd.f32 %v5422_v51, %v3365_v45  ;;  %v3368_v12 = vmul.f32 %v3783_v46, %v5410_v50  ;;  %v3850_v29 = vld [vmem:[%s3955_s24 + $0xd8] sm:$0xff] }
 0x45a   : > { %v3282_v60 = vpop.f32.mrf.mxu1 }
 0x45b   : > { %v3470_v41 = vmax.f32 %v3438_v26, 0.0  ;;  %v3436_v44 = vadd.f32 %v3839_v1, %v3404_v17  ;;  %v3407_v36 = vadd.f32 %v5422_v51, %v3368_v12  ;;  %v3366_v37 = vmul.f32 %v5410_v50, %v3282_v60  ;;  %v3851_v26 = vld [vmem:[%s3955_s24 + $0xc8] sm:$0xff] }
 0x45d   : > { %3502 = vst.msk [vmem:[%s5459_s19 + $0x90] sm:$0xff] %vm425_vm1, %v3470_v41  ;;  %v3468_v42 = vmax.f32 %v3436_v44, 0.0  ;;  %v3439_v18 = vadd.f32 %v3840_v39, %v3407_v36  ;;  %v3405_v61 = vadd.f32 %v5422_v51, %v3366_v37 }
 0x45f   : > { %3500 = vst.msk [vmem:[%s5459_s19 + $0x80] sm:$0xff] %vm425_vm1, %v3468_v42  ;;  %v3471_v34 = vmax.f32 %v3439_v18, 0.0  ;;  %v3437_v23 = vadd.f32 %v3841_v31, %v3405_v61  ;;  %v3852_v42 = vld [vmem:[%s3955_s24 + $0xf0] sm:$0xff] }
 0x461   : > { %3503 = vst.msk [vmem:[%s5459_s19 + $0x98] sm:$0xff] %vm425_vm1, %v3471_v34  ;;  %v3469_v52 = vmax.f32 %v3437_v23, 0.0  ;;  %v3853_v23 = vld [vmem:[%s3955_s24 + $0xe0] sm:$0xff] }
 0x463   : > { %3501 = vst.msk [vmem:[%s5459_s19 + $0x88] sm:$0xff] %vm425_vm1, %v3469_v52 }
 0x48e   : > { %v3786_v50 = vpop.f32.mrf.mxu1 }
 0x48f   : > { %v3371_v51 = vmul.f32 %v5943_v30, %v3786_v50 }
 0x490   : > { %v3295_v28 = vpop.f32.mrf.mxu1 }
 0x491   : > { %v3410_v24 = vadd.f32 %v5949_v38, %v3371_v51  ;;  %v3369_v4 = vmul.f32 %v5943_v30, %v3295_v28 }
 0x492   : > { %v3787_v54 = vpop.f32.mrf.mxu1 }
 0x493   : > { %v3442_v27 = vadd.f32 %v3844_v9, %v3410_v24  ;;  %v3408_v3 = vadd.f32 %v5949_v38, %v3369_v4  ;;  %v3372_v5 = vmul.f32 %v5943_v30, %v3787_v54  ;;  %v3854_v24 = vld [vmem:[%s3955_s24 + $0xf8] sm:$0xff] }
 0x494   : > { %v3298_v40 = vpop.f32.mrf.mxu1 }
 0x495   : > { %v3474_v43 = vmax.f32 %v3442_v27, 0.0  ;;  %v3440_v0 = vadd.f32 %v3845_v58, %v3408_v3  ;;  %v3411_v15 = vadd.f32 %v5949_v38, %v3372_v5  ;;  %v3370_v25 = vmul.f32 %v5943_v30, %v3298_v40  ;;  %v3855_v27 = vld [vmem:[%s3955_s24 + $0xe8] sm:$0xff] }
 0x497   : > { %3506 = vst.msk [vmem:[%s5459_s19 + $0xb0] sm:$0xff] %vm425_vm1, %v3474_v43  ;;  %v3472_v2 = vmax.f32 %v3440_v0, 0.0  ;;  %v3443_v62 = vadd.f32 %v3846_v32, %v3411_v15  ;;  %v3409_v21 = vadd.f32 %v5949_v38, %v3370_v25 }
 0x499   : > { %3504 = vst.msk [vmem:[%s5459_s19 + $0xa0] sm:$0xff] %vm425_vm1, %v3472_v2  ;;  %v3475_v55 = vmax.f32 %v3443_v62, 0.0  ;;  %v3441_v63 = vadd.f32 %v3847_v48, %v3409_v21 }
 0x49b   : > { %3507 = vst.msk [vmem:[%s5459_s19 + $0xb8] sm:$0xff] %vm425_vm1, %v3475_v55  ;;  %v3473_v53 = vmax.f32 %v3441_v63, 0.0 }
 0x49d   : > { %3505 = vst.msk [vmem:[%s5459_s19 + $0xa8] sm:$0xff] %vm425_vm1, %v3473_v53 }
 0x4be   : > { %v3790_v59 = vpop.f32.mrf.mxu1 }
 0x4bf   : > { %v3375_v16 = vmul.f32 %v5943_v30, %v3790_v59 }
 0x4c0   : > { %v3311_v13 = vpop.f32.mrf.mxu1 }
 0x4c1   : > { %v3414_v7 = vadd.f32 %v5949_v38, %v3375_v16  ;;  %v3373_v20 = vmul.f32 %v5943_v30, %v3311_v13 }
 0x4c2   : > { %v3791_v47 = vpop.f32.mrf.mxu1 }
 0x4c3   : > { %v3446_v33 = vadd.f32 %v3848_v10, %v3414_v7  ;;  %v3412_v56 = vadd.f32 %v5949_v38, %v3373_v20  ;;  %v3376_v35 = vmul.f32 %v5943_v30, %v3791_v47 }
 0x4c4   : > { %v3314_v8 = vpop.f32.mrf.mxu1 }
 0x4c5   : > { %v3478_v49 = vmax.f32 %v3446_v33, 0.0  ;;  %v3444_v57 = vadd.f32 %v3849_v11, %v3412_v56  ;;  %v3415_v22 = vadd.f32 %v5949_v38, %v3376_v35  ;;  %v3374_v6 = vmul.f32 %v5943_v30, %v3314_v8 }
 0x4c7   : > { %3510 = vst.msk [vmem:[%s5459_s19 + $0xd0] sm:$0xff] %vm425_vm1, %v3478_v49  ;;  %v3476_v14 = vmax.f32 %v3444_v57, 0.0  ;;  %v3447_v45 = vadd.f32 %v3850_v29, %v3415_v22  ;;  %v3413_v46 = vadd.f32 %v5949_v38, %v3374_v6 }
 0x4c9   : > { %3508 = vst.msk [vmem:[%s5459_s19 + $0xc0] sm:$0xff] %vm425_vm1, %v3476_v14  ;;  %v3479_v19 = vmax.f32 %v3447_v45, 0.0  ;;  %v3445_v17 = vadd.f32 %v3851_v26, %v3413_v46 }
 0x4cb   : > { %3511 = vst.msk [vmem:[%s5459_s19 + $0xd8] sm:$0xff] %vm425_vm1, %v3479_v19  ;;  %v3477_v12 = vmax.f32 %v3445_v17, 0.0 }
 0x4cd   : > { %3509 = vst.msk [vmem:[%s5459_s19 + $0xc8] sm:$0xff] %vm425_vm1, %v3477_v12 }
 0x4da   : > { %v3794_v60 = vpop.f32.mrf.mxu1 }
 0x4db   : > { %v3379_v41 = vmul.f32 %v5943_v30, %v3794_v60 }
 0x4dc   : > { %v3327_v1 = vpop.f32.mrf.mxu1 }
 0x4dd   : > { %v3418_v44 = vadd.f32 %v5949_v38, %v3379_v41  ;;  %v3377_v36 = vmul.f32 %v5943_v30, %v3327_v1 }
 0x4de   : > { %v3795_v37 = vpop.f32.mrf.mxu1 }
 0x4df   : > { %v3450_v39 = vadd.f32 %v3852_v42, %v3418_v44  ;;  %v3416_v18 = vadd.f32 %v5949_v38, %v3377_v36  ;;  %v3380_v61 = vmul.f32 %v5943_v30, %v3795_v37 }
 0x4e0   : > { %v3330_v34 = vpop.f32.mrf.mxu1 }
 0x4e1   : > { %v3482_v31 = vmax.f32 %v3450_v39, 0.0  ;;  %v3448_v52 = vadd.f32 %v3853_v23, %v3416_v18  ;;  %v3419_v50 = vadd.f32 %v5949_v38, %v3380_v61  ;;  %v3378_v51 = vmul.f32 %v5943_v30, %v3330_v34 }
 0x4e3   : > { %3514 = vst.msk [vmem:[%s5459_s19 + $0xf0] sm:$0xff] %vm425_vm1, %v3482_v31  ;;  %v3480_v28 = vmax.f32 %v3448_v52, 0.0  ;;  %v3451_v4 = vadd.f32 %v3854_v24, %v3419_v50  ;;  %v3417_v54 = vadd.f32 %v5949_v38, %v3378_v51 }
 0x4e5   : > { %3512 = vst.msk [vmem:[%s5459_s19 + $0xe0] sm:$0xff] %vm425_vm1, %v3480_v28  ;;  %v3483_v9 = vmax.f32 %v3451_v4, 0.0  ;;  %v3449_v3 = vadd.f32 %v3855_v27, %v3417_v54 }
 0x4e7   : > { %3515 = vst.msk [vmem:[%s5459_s19 + $0xf8] sm:$0xff] %vm425_vm1, %v3483_v9  ;;  %v3481_v5 = vmax.f32 %v3449_v3, 0.0 }
 0x4e9   : > { %3513 = vst.msk [vmem:[%s5459_s19 + $0xe8] sm:$0xff] %vm425_vm1, %v3481_v5 }
 0x4ea PF: > { %s20_s13 = sadd.s32 1, %s3862_s13  }
 0x4eb   : > { %p17_p4 = scmp.ge.s32.totalorder %s20_s13, 4  }
 0x4ed   :  { %19 = sbr.rel (!%p17_p4) target bundleno = 1 (0x1), region = 90 }

</bundles_post_ra>
